<compile_context>
chip_gen: v7x
topology: tpu7x:2x2x1
jax: 0.10.0
libtpu: 0.0.40
codegen_flags: <defaults>
</compile_context>

<pallas_src>
import functools

import jax
import jax.numpy as jnp
from jax.experimental import pallas as pl
from jax.experimental.pallas import tpu as pltpu


def _round_up(n, m):
    return ((n + m - 1) // m) * m


def _cdiv(a, b):
    return -(-a // b)


def _make_mlp_kernel(n_layers):
    """Fused MLP kernel for `n_layers` Linear layers with ReLU in between."""

    def kernel(*refs):
        x_ref = refs[0]
        out_ref = refs[-1]
        p_refs = refs[1:-1]  # (w0, b0, w1, b1, ..., w_last, b_last)

        # Cast x to the matmul operand dtype in-kernel (VPU work hidden under
        # the DMA) instead of materializing a cast copy of x in HBM.
        h = x_ref[...].astype(p_refs[0].dtype)
        for li in range(n_layers):
            w_ref = p_refs[2 * li]
            b_ref = p_refs[2 * li + 1]
            # MXU matmul with f32 accumulation; bias-add / ReLU stay in f32.
            h = jnp.dot(h, w_ref[...], preferred_element_type=jnp.float32)
            h = h + b_ref[...]
            if li < n_layers - 1:
                h = jnp.maximum(h, 0.0).astype(p_refs[2 * (li + 1)].dtype)
        out_ref[...] = h  # f32 == out_ref.dtype

    return kernel


def _prepare_params(params, compute_dtype):
    """PyTorch-style (W(out,in), b(out,)) -> ((in_p, out_p) W.T, (1, out_p) bias).

    Only inter-layer (hidden) feature dims are padded to multiples of 128;
    the network's input dim (layer 0 K) and output dim (last layer N) keep
    their real widths so no wrapper-side padding/slicing of x or y is needed.
    """
    n = len(params)
    prepped = []
    for li, (w, b) in enumerate(params):
        out_dim, in_dim = w.shape
        in_p = in_dim if li == 0 else _round_up(in_dim, 128)
        out_p = out_dim if li == n - 1 else _round_up(out_dim, 128)
        w_t = jnp.zeros((in_p, out_p), compute_dtype)
        w_t = w_t.at[:in_dim, :out_dim].set(w.T.astype(compute_dtype))
        b_row = jnp.zeros((1, out_p), jnp.float32).at[0, :out_dim].set(b)
        prepped.append((w_t, b_row))
    return prepped


def _choose_batch_tile(B, block_batch):
    """Pick (tb, nb): big tiles, even number of grid steps for large B."""
    tb = max(8, _round_up(min(block_batch, _round_up(B, 8)), 8))
    nb = _cdiv(B, tb)
    if nb == 1:
        if B >= 256:  # enough rows to split across v7x's 2 TensorCores
            nb = 2
    elif nb % 2 == 1:
        nb += 1
    tb = max(8, _round_up(_cdiv(B, nb), 8))
    nb = _cdiv(B, tb)
    return tb, nb


def nn_forward(x, params, *, block_batch=2048, compute_dtype=jnp.bfloat16):
    """Fused MLP forward pass as one batch-tiled Pallas kernel.

    x:      (B, layers[0]) float32
    params: list of PyTorch-style (W (out,in), b (out,)) float32 arrays
    """
    n_layers = len(params)
    out_dim = params[-1][0].shape[0]
    B, in_dim = x.shape

    prepped = _prepare_params(params, compute_dtype)
    tb, nb = _choose_batch_tile(B, block_batch)

    # x / out tiled over the batch (partial last block handled by Pallas);
    # weights & biases are full-array blocks with constant index_maps
    # (VMEM-resident across all grid steps) and single-buffered.
    in_specs = [pl.BlockSpec((tb, in_dim), lambda i: (i, 0))]
    flat_params = []
    for w_t, b_row in prepped:
        in_specs.append(pl.BlockSpec(w_t.shape, lambda i: (0, 0),
                                     pipeline_mode=pl.Buffered(1)))
        in_specs.append(pl.BlockSpec(b_row.shape, lambda i: (0, 0),
                                     pipeline_mode=pl.Buffered(1)))
        flat_params.extend([w_t, b_row])
    out_spec = pl.BlockSpec((tb, out_dim), lambda i: (i, 0))

    flops = 2 * B * sum(int(w.shape[0]) * int(w.shape[1]) for w, _ in params)
    bytes_accessed = (
        int(x.size) * x.dtype.itemsize
        + sum(int(w.size) * w.dtype.itemsize + int(b.size) * b.dtype.itemsize
              for w, b in prepped)
        + B * out_dim * 4)

    y = pl.pallas_call(
        _make_mlp_kernel(n_layers),
        out_shape=jax.ShapeDtypeStruct((B, out_dim), jnp.float32),
        grid_spec=pltpu.PrefetchScalarGridSpec(
            num_scalar_prefetch=0,
            grid=(nb,),
            in_specs=in_specs,
            out_specs=out_spec,
        ),
        compiler_params=pltpu.CompilerParams(
            dimension_semantics=("parallel",),
            vmem_limit_bytes=32 * 1024 * 1024,
        ),
        cost_estimate=pl.CostEstimate(
            flops=flops, transcendentals=0, bytes_accessed=bytes_accessed),
    )(x, *flat_params)

    return y


def init_params(key, layers):
    """Deterministic init matching the PyTorch __init__:
    kaiming_normal_(weight, nonlinearity='relu') and constant_(bias, 0.01).
    Returns PyTorch-style (W (out,in), b (out,)) float32 arrays."""
    params = []
    for i in range(len(layers) - 1):
        fan_in, fan_out = layers[i], layers[i + 1]
        key, sub = jax.random.split(key)
        std = (2.0 / fan_in) ** 0.5
        w = jax.random.normal(sub, (fan_out, fan_in), dtype=jnp.float32) * std
        b = jnp.full((fan_out,), 0.01, dtype=jnp.float32)
        params.append((w, b))
    return params


def nn_forward_ref(x, params):
    """Pure-JAX f32 reference of the same forward pass."""
    h = x
    for i, (w, b) in enumerate(params):
        h = h @ w.T + b
        if i < len(params) - 1:
            h = jnp.maximum(h, 0.0)
    return h


if __name__ == "__main__":
    # layers = [input_dim, hidden, hidden, output_dim]  (depth = 2 hidden layers)
    layers = [32, 64, 64, 1]
    batch = 1000  # not a multiple of the tile -> exercises the partial last block

    key = jax.random.PRNGKey(0)
    key_x, key_p = jax.random.split(key)

    x = jax.random.normal(key_x, (batch, layers[0]), dtype=jnp.float32)
    params = init_params(key_p, layers)

    y_ref = nn_forward_ref(x, params)

    # f32 path (tight validation).
    fwd_f32 = jax.jit(functools.partial(nn_forward, compute_dtype=jnp.float32))
    y = jax.block_until_ready(fwd_f32(x, params))
    assert y.shape == (batch, layers[-1])
    assert jnp.allclose(y, y_ref, atol=1e-5, rtol=1e-5), "f32 mismatch vs reference"

    # bf16-operand / f32-accumulate path (default; loose validation).
    fwd_bf16 = jax.jit(functools.partial(nn_forward, compute_dtype=jnp.bfloat16))
    y_bf16 = jax.block_until_ready(fwd_bf16(x, params))
    assert y_bf16.shape == (batch, layers[-1])
    assert jnp.allclose(y_bf16, y_ref, atol=5e-2, rtol=5e-2), "bf16 mismatch vs reference"

    # TODO(synk): loss()/train_model()/test_model()/predict() are host-side
    # training/eval utilities, not part of forward(); not translated to Pallas.
    print("KERNEL_OK")
</pallas_src>

<mosaic_0001>
module attributes {stable_mosaic.version = 11 : i64} {
  func.func @kernel(%arg0: i32, %arg1: memref<504x32xf32, #tpu.memory_space<vmem>>, %arg2: memref<32x128xf32, #tpu.memory_space<vmem>>, %arg3: memref<1x128xf32, #tpu.memory_space<vmem>>, %arg4: memref<128x128xf32, #tpu.memory_space<vmem>>, %arg5: memref<1x128xf32, #tpu.memory_space<vmem>>, %arg6: memref<128x1xf32, #tpu.memory_space<vmem>>, %arg7: memref<1x1xf32, #tpu.memory_space<vmem>>, %arg8: memref<504x1xf32, #tpu.memory_space<vmem>>) attributes {dimension_semantics = [#tpu.dimension_semantics<parallel>], iteration_bounds = array<i64: 2>, scalar_prefetch = 0 : i64, scratch_operands = 0 : i64, tpu.core_type = #tpu.core_type<tc>, window_params = [{transform_indices = @transform_0, window_bounds = array<i64: 504, 32>}, {pipeline_mode = #tpu.pipeline_mode<synchronous>, transform_indices = @transform_1, window_bounds = array<i64: 32, 128>}, {pipeline_mode = #tpu.pipeline_mode<synchronous>, transform_indices = @transform_2, window_bounds = array<i64: 1, 128>}, {pipeline_mode = #tpu.pipeline_mode<synchronous>, transform_indices = @transform_3, window_bounds = array<i64: 128, 128>}, {pipeline_mode = #tpu.pipeline_mode<synchronous>, transform_indices = @transform_4, window_bounds = array<i64: 1, 128>}, {pipeline_mode = #tpu.pipeline_mode<synchronous>, transform_indices = @transform_5, window_bounds = array<i64: 128, 1>}, {pipeline_mode = #tpu.pipeline_mode<synchronous>, transform_indices = @transform_6, window_bounds = array<i64: 1, 1>}, {transform_indices = @transform_7, window_bounds = array<i64: 504, 1>}]} {
    %c0 = arith.constant 0 : index
    %c0_0 = arith.constant 0 : index
    %0 = vector.load %arg1[%c0, %c0_0] : memref<504x32xf32, #tpu.memory_space<vmem>>, vector<504x32xf32>
    %c0_1 = arith.constant 0 : index
    %c0_2 = arith.constant 0 : index
    %1 = vector.load %arg2[%c0_1, %c0_2] : memref<32x128xf32, #tpu.memory_space<vmem>>, vector<32x128xf32>
    %cst = arith.constant dense<0.000000e+00> : vector<504x128xf32>
    %2 = tpu.matmul %0, %1, %cst {dimension_numbers = #tpu.dot_dimension_numbers<[1], [0], [0], [1], [0, 0, 1, 1], [], []>} : vector<504x32xf32>, vector<32x128xf32>, vector<504x128xf32> -> vector<504x128xf32>
    %c0_3 = arith.constant 0 : index
    %c0_4 = arith.constant 0 : index
    %3 = vector.load %arg3[%c0_3, %c0_4] : memref<1x128xf32, #tpu.memory_space<vmem>>, vector<1x128xf32>
    %4 = vector.broadcast %3 : vector<1x128xf32> to vector<504x128xf32>
    %5 = arith.addf %2, %4 : vector<504x128xf32>
    %cst_5 = arith.constant 0.000000e+00 : f32
    %6 = vector.broadcast %cst_5 : f32 to vector<504x128xf32>
    %7 = arith.maximumf %5, %6 : vector<504x128xf32>
    %c0_6 = arith.constant 0 : index
    %c0_7 = arith.constant 0 : index
    %8 = vector.load %arg4[%c0_6, %c0_7] : memref<128x128xf32, #tpu.memory_space<vmem>>, vector<128x128xf32>
    %cst_8 = arith.constant dense<0.000000e+00> : vector<504x128xf32>
    %9 = tpu.matmul %7, %8, %cst_8 {dimension_numbers = #tpu.dot_dimension_numbers<[1], [0], [0], [1], [0, 0, 1, 1], [], []>} : vector<504x128xf32>, vector<128x128xf32>, vector<504x128xf32> -> vector<504x128xf32>
    %c0_9 = arith.constant 0 : index
    %c0_10 = arith.constant 0 : index
    %10 = vector.load %arg5[%c0_9, %c0_10] : memref<1x128xf32, #tpu.memory_space<vmem>>, vector<1x128xf32>
    %11 = vector.broadcast %10 : vector<1x128xf32> to vector<504x128xf32>
    %12 = arith.addf %9, %11 : vector<504x128xf32>
    %cst_11 = arith.constant 0.000000e+00 : f32
    %13 = vector.broadcast %cst_11 : f32 to vector<504x128xf32>
    %14 = arith.maximumf %12, %13 : vector<504x128xf32>
    %c0_12 = arith.constant 0 : index
    %c0_13 = arith.constant 0 : index
    %15 = vector.load %arg6[%c0_12, %c0_13] : memref<128x1xf32, #tpu.memory_space<vmem>>, vector<128x1xf32>
    %cst_14 = arith.constant dense<0.000000e+00> : vector<504x1xf32>
    %16 = tpu.matmul %14, %15, %cst_14 {dimension_numbers = #tpu.dot_dimension_numbers<[1], [0], [0], [1], [0, 0, 1, 1], [], []>} : vector<504x128xf32>, vector<128x1xf32>, vector<504x1xf32> -> vector<504x1xf32>
    %c0_15 = arith.constant 0 : index
    %c0_16 = arith.constant 0 : index
    %17 = vector.load %arg7[%c0_15, %c0_16] : memref<1x1xf32, #tpu.memory_space<vmem>>, vector<1x1xf32>
    %18 = vector.broadcast %17 : vector<1x1xf32> to vector<504x1xf32>
    %19 = arith.addf %16, %18 : vector<504x1xf32>
    %c0_17 = arith.constant 0 : index
    %c0_18 = arith.constant 0 : index
    %20 = vector.load %arg8[%c0_17, %c0_18] : memref<504x1xf32, #tpu.memory_space<vmem>>, vector<504x1xf32>
    tpu.vector_store %arg8[%c0_17, %c0_18], %19 {strides = array<i32>} : memref<504x1xf32, #tpu.memory_space<vmem>>, vector<504x1xf32>,
    return
  }
  func.func @transform_0(%arg0: i32) -> (i32, i32) {
    %c0_i32 = arith.constant 0 : i32
    %c0_i32_0 = arith.constant 0 : i32
    return %arg0, %c0_i32 : i32, i32
  }
  func.func @transform_1(%arg0: i32) -> (i32, i32) {
    %c0_i32 = arith.constant 0 : i32
    %c0_i32_0 = arith.constant 0 : i32
    %c0_i32_1 = arith.constant 0 : i32
    return %c0_i32, %c0_i32_0 : i32, i32
  }
  func.func @transform_2(%arg0: i32) -> (i32, i32) {
    %c0_i32 = arith.constant 0 : i32
    %c0_i32_0 = arith.constant 0 : i32
    %c0_i32_1 = arith.constant 0 : i32
    return %c0_i32, %c0_i32_0 : i32, i32
  }
  func.func @transform_3(%arg0: i32) -> (i32, i32) {
    %c0_i32 = arith.constant 0 : i32
    %c0_i32_0 = arith.constant 0 : i32
    %c0_i32_1 = arith.constant 0 : i32
    return %c0_i32, %c0_i32_0 : i32, i32
  }
  func.func @transform_4(%arg0: i32) -> (i32, i32) {
    %c0_i32 = arith.constant 0 : i32
    %c0_i32_0 = arith.constant 0 : i32
    %c0_i32_1 = arith.constant 0 : i32
    return %c0_i32, %c0_i32_0 : i32, i32
  }
  func.func @transform_5(%arg0: i32) -> (i32, i32) {
    %c0_i32 = arith.constant 0 : i32
    %c0_i32_0 = arith.constant 0 : i32
    %c0_i32_1 = arith.constant 0 : i32
    return %c0_i32, %c0_i32_0 : i32, i32
  }
  func.func @transform_6(%arg0: i32) -> (i32, i32) {
    %c0_i32 = arith.constant 0 : i32
    %c0_i32_0 = arith.constant 0 : i32
    %c0_i32_1 = arith.constant 0 : i32
    return %c0_i32, %c0_i32_0 : i32, i32
  }
  func.func @transform_7(%arg0: i32) -> (i32, i32) {
    %c0_i32 = arith.constant 0 : i32
    %c0_i32_0 = arith.constant 0 : i32
    return %arg0, %c0_i32 : i32, i32
  }
}

</mosaic_0001>

<bundles_post_ra>
// kernel: nn_forward.1
= control target key start
LH: loop header
LB: loop body
LE: loop exit
PB: predicated region body
PF: predicated region fallthrough
CT: control target
= control target key end

     0   :  { %s4937_s0 = inlined_call_operand.vmem [shape: f32[1000,32], index: 0, kind: input, shape index: {}]   ;;  %s4938_s1 = inlined_call_operand.vmem [shape: f32[32,128], index: 1, kind: input, shape index: {}]   ;;  %s4939_s2 = inlined_call_operand.vmem [shape: f32[1,128], index: 2, kind: input, shape index: {}]   ;;  %s4940_s3 = inlined_call_operand.vmem [shape: f32[128,128], index: 3, kind: input, shape index: {}]   ;;  %s4941_s4 = inlined_call_operand.vmem [shape: f32[1,128], index: 4, kind: input, shape index: {}]   ;;  %s4942_s5 = inlined_call_operand.vmem [shape: f32[128,1], index: 5, kind: input, shape index: {}]   ;;  %s4943_s6 = inlined_call_operand.<no memory space> [shape: f32[1,1], index: 6, kind: input, shape index: {}]   ;;  %s4944_s7 = inlined_call_operand.vmem [shape: f32[1000,1], index: 7, kind: output, shape index: {}]  }
   0x1   :  { %v12_v0 = vstv %s4943_s6 }
   0x2   :  { %13 = vst [vmem:[#allocation2] sm:$0x1] %v12_v0 }
   0x3   :  { %s3644_s26 = smov 0   ;;  %s3646_s27 = smov 0  }
   0x4   :  { %s3648_s28 = smov 0  }
   0x5 LB: > { %s3657_s6 = sadd.s32 4294967295, %s3564_s28   ;;  %s3659_s29 = sadd.s32 1, %s3564_s28   ;;  %s3564_s28 = sphi %s3648_s28, %s4953_s28   ;;  %s3560_s27 = sphi %s3646_s27, %s4952_s27   ;;  %s3556_s26 = sphi %s3644_s26, %s4951_s26  }
   0x6   : > { %s175_s30 = ssub.s32 %s3564_s28, %s3659_s29  ;;  %s178_s8 = sadd.s32 1, %s3560_s27 }
   0x7   : > { %p176_p0 = scmp.eq.s32.totalorder %s175_s30, 0  ;;  %p188_p1 = scmp.ne.s32.totalorder %s3560_s27, %s3556_s26 }
   0x8   : > { %p189_p2 = scmp.eq.s32.totalorder %s3657_s6, 1  ;;  %p2410_p3 = scmp.ge.s32.totalorder %s3564_s28, 1 }
   0x9   : > { %s3667_s9 = scalar_select %p176_p0, %s3560_s27, %s178_s8  }
   0xa   : > { %p3669_p4 = por %p189_p2, %p188_p1  ;;  %p248_p5 = scmp.lt.s32.totalorder %s3564_s28, 3 }
   0xc   : > { %p249_p6 = pnand %p2410_p3, %p248_p5 }
   0xd   : > { %v365_v1 = vld [vmem:[%s4938_s1] sm:$0xff] (!%p249_p6)  ;;  %v366_v2 = vld [vmem:[%s4938_s1 + $0x8] sm:$0xff] (!%p249_p6)  ;;  %v367_v3 = vld [vmem:[%s4938_s1 + $0x10] sm:$0xff] (!%p249_p6)  ;;  %v3598_v4 = vmov (!%p249_p6), 0.0|0.0   ;;  %vm3599_vm0 = vmmov (!%p249_p6), 0   ;;  %v3600_v7 = vmov (!%p249_p6), 0.0  }
   0xe   : > { %252 = sbr.rel (%p249_p6) target bundleno = 1005 (0x3ed), region = 48  ;;  %3355 = vmatprep.subr.bf16.mxu0 (!%p249_p6), %v3598_v4  ;;  %v3356_v5 = vpack.c.bf16 (!%p249_p6), %v366_v2, %v365_v1  ;;  %v368_v6 = vld [vmem:[%s4938_s1 + $0x18] sm:$0xff] (!%p249_p6)  ;;  %2724 = vmatprep.mubr.msk.f32.mxu0 (!%p249_p6), %vm3599_vm0, %v3600_v7  ;;  %vm376_vm1 = vcmask (!%p249_p6), 261120   ;;  %v1009_v11 = vld [vmem:[%s4940_s3] sm:$0xff] (!%p249_p6)  ;;  %v1010_v12 = vld [vmem:[%s4940_s3 + $0x8] sm:$0xff] (!%p249_p6)  ;;  %s280_s30 = sand.u32 (!%p249_p6), 1, %s3556_s26  }
   0xf   : > { %s3689_s19 = smul.u32 (!%p249_p6), 63, %s3657_s6  ;;  %3409 = vmatprep.subr.bf16.mxu1 (!%p249_p6), %v3598_v4  ;;  %2820 = vmatprep.mubr.msk.f32.mxu1 (!%p249_p6), %vm3599_vm0, %v3600_v7  ;;  %v3359_v8 = vpack.c.bf16 (!%p249_p6), %v368_v6, %v367_v3  ;;  %v3362_v13 = vpack.c.bf16 (!%p249_p6), %v1010_v12, %v1009_v11  ;;  %v1011_v16 = vld [vmem:[%s4940_s3 + $0x10] sm:$0xff] (!%p249_p6)  ;;  %v1012_v17 = vld [vmem:[%s4940_s3 + $0x18] sm:$0xff] (!%p249_p6)  ;;  %v1013_v21 = vld [vmem:[%s4940_s3 + $0x20] sm:$0xff] (!%p249_p6)  ;;  %vm1878_vm2 = vcmask (!%p249_p6), 7168  }
  0x10   : > { %3357 = vmatpush3.bf16.msra.mxu0 (!%p249_p6), %v3356_v5  ;;  %3411 = vmatpush3.bf16.msra.mxu1 (!%p249_p6), %v3356_v5  ;;  %v3365_v20 = vpack.c.bf16 (!%p249_p6), %v1012_v17, %v1011_v16  ;;  %v1014_v22 = vld [vmem:[%s4940_s3 + $0x28] sm:$0xff] (!%p249_p6)  ;;  %v1015_v26 = vld [vmem:[%s4940_s3 + $0x30] sm:$0xff] (!%p249_p6)  ;;  %v1016_v27 = vld [vmem:[%s4940_s3 + $0x38] sm:$0xff] (!%p249_p6)  ;;  %s3413_s8 = smul.u32 (!%p249_p6), 504, %s280_s30 }
  0x11   : > { %p288_p7 = scmp.lt.s32.totalorder (!%p249_p6), %s3689_s19, 124  ;;  %3358 = vmatprep.subr.bf16.mxu0 (!%p249_p6), %v3598_v4  ;;  %3410 = vmatprep.subr.bf16.mxu1 (!%p249_p6), %v3598_v4  ;;  %v3368_v25 = vpack.c.bf16 (!%p249_p6), %v1014_v22, %v1013_v21  ;;  %v3371_v30 = vpack.c.bf16 (!%p249_p6), %v1016_v27, %v1015_v26  ;;  %v1017_v31 = vld [vmem:[%s4940_s3 + $0x40] sm:$0xff] (!%p249_p6)  ;;  %v1018_v32 = vld [vmem:[%s4940_s3 + $0x48] sm:$0xff] (!%p249_p6)  ;;  %v1019_v36 = vld [vmem:[%s4940_s3 + $0x50] sm:$0xff] (!%p249_p6) }
  0x12   : > { %v3374_v35 = vpack.c.bf16 (!%p249_p6), %v1018_v32, %v1017_v31  ;;  %v1020_v37 = vld [vmem:[%s4940_s3 + $0x58] sm:$0xff] (!%p249_p6)  ;;  %v1021_v41 = vld [vmem:[%s4940_s3 + $0x60] sm:$0xff] (!%p249_p6)  ;;  %v1022_v42 = vld [vmem:[%s4940_s3 + $0x68] sm:$0xff] (!%p249_p6)  ;;  %s4524_s26 = scalar_lea.vmem (!%p249_p6), [#allocation3], %s3413_s8  }
  0x13   : > { %v3377_v40 = vpack.c.bf16 (!%p249_p6), %v1020_v37, %v1019_v36  ;;  %v3380_v45 = vpack.c.bf16 (!%p249_p6), %v1022_v42, %v1021_v41  ;;  %v1023_v46 = vld [vmem:[%s4940_s3 + $0x70] sm:$0xff] (!%p249_p6)  ;;  %v1024_v47 = vld [vmem:[%s4940_s3 + $0x78] sm:$0xff] (!%p249_p6)  ;;  %v1479_v41 = vld [vmem:[%s4942_s5 + $0x20] sm:$0xff] (!%p249_p6) }
  0x14   : > { %3360 = vmatpush3.bf16.msra.mxu0 (!%p249_p6), %v3359_v8  ;;  %3412 = vmatpush3.bf16.msra.mxu1 (!%p249_p6), %v3359_v8  ;;  %v3383_v50 = vpack.c.bf16 (!%p249_p6), %v1024_v47, %v1023_v46  ;;  %v1477_v37 = vld [vmem:[%s4942_s5 + $0x10] sm:$0xff] (!%p249_p6)  ;;  %v1480_v42 = vld [vmem:[%s4942_s5 + $0x28] sm:$0xff] (!%p249_p6) }
  0x15   : > { %s289_s20 = scalar_select %p288_p7, %s3689_s19, 124  ;;  %3361 = vmatprep.subr.bf16.mxu1 %v3598_v4  ;;  %3385 = vmatprep.subr.bf16.mxu0 %v3598_v4 }
  0x16   : > { %s2490_s11 = smul.u32 (%p3669_p4), 504, %s3657_s6 }
  0x17   : > { %s2411_s21 = sshll.u32 %s289_s20, 3 }
  0x18   : > { %s3701_s24 = scalar_lea.vmem %s4937_s0, %s2411_s21  ;;  %s4745_s14 = scalar_lea.vmem (%p3669_p4), %s4944_s7, %s2490_s11  }
  0x19   : > { %v302_v9 = vld [vmem:[%s3701_s24] sm:$0xff]  ;;  %v303_v10 = vld [vmem:[%s3701_s24 + $0x8] sm:$0xff]  ;;  %v304_v14 = vld [vmem:[%s3701_s24 + $0x10] sm:$0xff] }
  0x1a   : > { %2725 = vmatmul.mubr.msk.f32.vlgmr.msra.gmra.mrb[0].mxu0 %vm376_vm1, %v302_v9  ;;  %v334_v15 = vld [vmem:[%s3701_s24 + $0x100] sm:$0xff]  ;;  %v335_v18 = vld [vmem:[%s3701_s24 + $0x108] sm:$0xff]  ;;  %v305_v19 = vld [vmem:[%s3701_s24 + $0x18] sm:$0xff] }
  0x1b   : > { %2727 = vmatprep.mubr.msk.f32.mxu0 %vm3599_vm0, %v3600_v7  ;;  %2821 = vmatmul.mubr.msk.f32.vlgmr.msra.gmra.mrb[0].mxu1 %vm376_vm1, %v334_v15  ;;  %v336_v23 = vld [vmem:[%s3701_s24 + $0x110] sm:$0xff]  ;;  %v306_v24 = vld [vmem:[%s3701_s24 + $0x20] sm:$0xff]  ;;  %v337_v28 = vld [vmem:[%s3701_s24 + $0x118] sm:$0xff] }
  0x1c   : > { %3363 = vmatpush3.bf16.msra.mxu1 %v3362_v13  ;;  %2823 = vmatprep.mubr.msk.f32.mxu1 %vm3599_vm0, %v3600_v7  ;;  %v307_v29 = vld [vmem:[%s3701_s24 + $0x28] sm:$0xff]  ;;  %v338_v33 = vld [vmem:[%s3701_s24 + $0x120] sm:$0xff]  ;;  %v308_v34 = vld [vmem:[%s3701_s24 + $0x30] sm:$0xff] }
  0x1d   : > { %3364 = vmatprep.subr.bf16.mxu1 %v3598_v4  ;;  %v339_v38 = vld [vmem:[%s3701_s24 + $0x128] sm:$0xff]  ;;  %v309_v39 = vld [vmem:[%s3701_s24 + $0x38] sm:$0xff]  ;;  %v340_v43 = vld [vmem:[%s3701_s24 + $0x130] sm:$0xff] }
  0x1e   : > { %2728 = vmatmul.mubr.msk.f32.gmra.mrb[2].mxu0 %vm376_vm1, %v303_v10  ;;  %v310_v44 = vld [vmem:[%s3701_s24 + $0x40] sm:$0xff]  ;;  %v341_v48 = vld [vmem:[%s3701_s24 + $0x138] sm:$0xff]  ;;  %v311_v49 = vld [vmem:[%s3701_s24 + $0x48] sm:$0xff] }
  0x1f   : > { %2730 = vmatprep.mubr.msk.f32.mxu0 %vm3599_vm0, %v3600_v7  ;;  %2824 = vmatmul.mubr.msk.f32.gmra.mrb[2].mxu1 %vm376_vm1, %v335_v18  ;;  %v342_v51 = vld [vmem:[%s3701_s24 + $0x140] sm:$0xff]  ;;  %v312_v52 = vld [vmem:[%s3701_s24 + $0x50] sm:$0xff]  ;;  %v343_v53 = vld [vmem:[%s3701_s24 + $0x148] sm:$0xff] }
  0x20   : > { %2826 = vmatprep.mubr.msk.f32.mxu1 %vm3599_vm0, %v3600_v7  ;;  %3366 = vmatpush3.bf16.msra.mxu1 %v3365_v20  ;;  %v313_v54 = vld [vmem:[%s3701_s24 + $0x58] sm:$0xff]  ;;  %v344_v55 = vld [vmem:[%s3701_s24 + $0x150] sm:$0xff]  ;;  %v314_v56 = vld [vmem:[%s3701_s24 + $0x60] sm:$0xff] }
  0x21   : > { %3367 = vmatprep.subr.bf16.mxu1 %v3598_v4  ;;  %v345_v57 = vld [vmem:[%s3701_s24 + $0x158] sm:$0xff]  ;;  %v315_v58 = vld [vmem:[%s3701_s24 + $0x68] sm:$0xff]  ;;  %v346_v59 = vld [vmem:[%s3701_s24 + $0x160] sm:$0xff] }
  0x22   : > { %2731 = vmatmul.mubr.msk.f32.gmra.mrb[4].mxu0 %vm376_vm1, %v304_v14  ;;  %v316_v60 = vld [vmem:[%s3701_s24 + $0x70] sm:$0xff]  ;;  %v347_v61 = vld [vmem:[%s3701_s24 + $0x168] sm:$0xff]  ;;  %v317_v62 = vld [vmem:[%s3701_s24 + $0x78] sm:$0xff] }
  0x23   : > { %2733 = vmatprep.mubr.msk.f32.mxu0 %vm3599_vm0, %v3600_v7  ;;  %2827 = vmatmul.mubr.msk.f32.gmra.mrb[4].mxu1 %vm376_vm1, %v336_v23  ;;  %v348_v63 = vld [vmem:[%s3701_s24 + $0x170] sm:$0xff]  ;;  %v318_v0 = vld [vmem:[%s3701_s24 + $0x80] sm:$0xff]  ;;  %v349_v1 = vld [vmem:[%s3701_s24 + $0x178] sm:$0xff] }
  0x24   : > { %2829 = vmatprep.mubr.msk.f32.mxu1 %vm3599_vm0, %v3600_v7  ;;  %3369 = vmatpush3.bf16.msra.mxu1 %v3368_v25  ;;  %v319_v2 = vld [vmem:[%s3701_s24 + $0x88] sm:$0xff]  ;;  %v350_v3 = vld [vmem:[%s3701_s24 + $0x180] sm:$0xff]  ;;  %v320_v5 = vld [vmem:[%s3701_s24 + $0x90] sm:$0xff] }
  0x25   : > { %3370 = vmatprep.subr.bf16.mxu1 %v3598_v4  ;;  %v351_v6 = vld [vmem:[%s3701_s24 + $0x188] sm:$0xff]  ;;  %v321_v8 = vld [vmem:[%s3701_s24 + $0x98] sm:$0xff]  ;;  %v352_v9 = vld [vmem:[%s3701_s24 + $0x190] sm:$0xff] }
  0x26   : > { %2734 = vmatmul.mubr.msk.f32.gmra.mrb[6].mxu0 %vm376_vm1, %v305_v19  ;;  %v322_v10 = vld [vmem:[%s3701_s24 + $0xa0] sm:$0xff]  ;;  %v353_v11 = vld [vmem:[%s3701_s24 + $0x198] sm:$0xff]  ;;  %v323_v12 = vld [vmem:[%s3701_s24 + $0xa8] sm:$0xff] }
  0x27   : > { %2736 = vmatprep.mubr.msk.f32.mxu0 %vm3599_vm0, %v3600_v7  ;;  %2830 = vmatmul.mubr.msk.f32.gmra.mrb[6].mxu1 %vm376_vm1, %v337_v28  ;;  %v354_v13 = vld [vmem:[%s3701_s24 + $0x1a0] sm:$0xff]  ;;  %v324_v14 = vld [vmem:[%s3701_s24 + $0xb0] sm:$0xff]  ;;  %v355_v15 = vld [vmem:[%s3701_s24 + $0x1a8] sm:$0xff] }
  0x28   : > { %2832 = vmatprep.mubr.msk.f32.mxu1 %vm3599_vm0, %v3600_v7  ;;  %3372 = vmatpush3.bf16.msra.mxu1 %v3371_v30  ;;  %v325_v16 = vld [vmem:[%s3701_s24 + $0xb8] sm:$0xff]  ;;  %v356_v17 = vld [vmem:[%s3701_s24 + $0x1b0] sm:$0xff]  ;;  %v326_v18 = vld [vmem:[%s3701_s24 + $0xc0] sm:$0xff] }
  0x29   : > { %3373 = vmatprep.subr.bf16.mxu1 %v3598_v4  ;;  %v357_v19 = vld [vmem:[%s3701_s24 + $0x1b8] sm:$0xff]  ;;  %v327_v20 = vld [vmem:[%s3701_s24 + $0xc8] sm:$0xff]  ;;  %v358_v21 = vld [vmem:[%s3701_s24 + $0x1c0] sm:$0xff] }
  0x2a   : > { %2737 = vmatmul.mubr.msk.f32.gmra.mrb[8].mxu0 %vm376_vm1, %v306_v24  ;;  %v328_v22 = vld [vmem:[%s3701_s24 + $0xd0] sm:$0xff]  ;;  %v359_v23 = vld [vmem:[%s3701_s24 + $0x1c8] sm:$0xff]  ;;  %v329_v24 = vld [vmem:[%s3701_s24 + $0xd8] sm:$0xff] }
  0x2b   : > { %2739 = vmatprep.mubr.msk.f32.mxu0 %vm3599_vm0, %v3600_v7  ;;  %2833 = vmatmul.mubr.msk.f32.gmra.mrb[8].mxu1 %vm376_vm1, %v338_v33  ;;  %v360_v25 = vld [vmem:[%s3701_s24 + $0x1d0] sm:$0xff]  ;;  %v330_v26 = vld [vmem:[%s3701_s24 + $0xe0] sm:$0xff]  ;;  %v361_v27 = vld [vmem:[%s3701_s24 + $0x1d8] sm:$0xff] }
  0x2c   : > { %2835 = vmatprep.mubr.msk.f32.mxu1 %vm3599_vm0, %v3600_v7  ;;  %3375 = vmatpush3.bf16.msra.mxu1 %v3374_v35  ;;  %v331_v28 = vld [vmem:[%s3701_s24 + $0xe8] sm:$0xff]  ;;  %v332_v30 = vld [vmem:[%s3701_s24 + $0xf0] sm:$0xff]  ;;  %v333_v32 = vld [vmem:[%s3701_s24 + $0xf8] sm:$0xff] }
  0x2d   : > { %3376 = vmatprep.subr.bf16.mxu1 %v3598_v4  ;;  %v363_v31 = vld [vmem:[%s3701_s24 + $0x1e8] sm:$0xff]  ;;  %v364_v33 = vld [vmem:[%s3701_s24 + $0x1f0] sm:$0xff] }
  0x2e   : > { %2740 = vmatmul.mubr.msk.f32.gmra.mrb[10].mxu0 %vm376_vm1, %v307_v29  ;;  %v362_v29 = vld [vmem:[%s3701_s24 + $0x1e0] sm:$0xff]  ;;  %v1476_v35 = vld [vmem:[%s4942_s5 + $0x8] sm:$0xff]  ;;  %s1950_s24 = ssub.s32 (%p3669_p4), 125, %s3689_s19 }
  0x2f   : > { %2742 = vmatprep.mubr.msk.f32.mxu0 %vm3599_vm0, %v3600_v7  ;;  %2836 = vmatmul.mubr.msk.f32.gmra.mrb[10].mxu1 %vm376_vm1, %v339_v38  ;;  %v1478_v38 = vld [vmem:[%s4942_s5 + $0x18] sm:$0xff]  ;;  %p1951_p8 = scmp.lt.s32.totalorder (%p3669_p4), %s1950_s24, 63 }
  0x30   : > { %2838 = vmatprep.mubr.msk.f32.mxu1 %vm3599_vm0, %v3600_v7  ;;  %3378 = vmatpush3.bf16.msra.mxu1 %v3377_v40  ;;  %v4029_v40 = vld [vmem:[%s4939_s2] ss:$0 sm:$0xff] }
  0x31   : > { %3379 = vmatprep.subr.bf16.mxu1 %v3598_v4 }
  0x32   : > { %2743 = vmatmul.mubr.msk.f32.gmra.mrb[12].mxu0 %vm376_vm1, %v308_v34  ;;  %v1475_v34 = vld [vmem:[%s4942_s5] sm:$0xff] }
  0x33   : > { %2745 = vmatprep.mubr.msk.f32.mxu0 %vm3599_vm0, %v3600_v7  ;;  %2839 = vmatmul.mubr.msk.f32.gmra.mrb[12].mxu1 %vm376_vm1, %v340_v43  ;;  %v3386_v36 = vpack.c.bf16 %v1476_v35, %v1475_v34 }
  0x34   : > { %2841 = vmatprep.mubr.msk.f32.mxu1 %vm3599_vm0, %v3600_v7  ;;  %3381 = vmatpush3.bf16.msra.mxu1 %v3380_v45 }
  0x35   : > { %3382 = vmatprep.subr.bf16.mxu1 %v3598_v4  ;;  %3387 = vmatpush3.bf16.msra.mxu0 %v3386_v36 }
  0x36   : > { %2746 = vmatmul.mubr.msk.f32.gmra.mrb[14].mxu0 %vm376_vm1, %v309_v39  ;;  %3388 = vmatprep.subr.bf16.mxu0 %v3598_v4  ;;  %v3389_v39 = vpack.c.bf16 %v1478_v38, %v1477_v37 }
  0x37   : > { %2748 = vmatprep.mubr.msk.f32.mxu0 %vm3599_vm0, %v3600_v7  ;;  %2842 = vmatmul.mubr.msk.f32.gmra.mrb[14].mxu1 %vm376_vm1, %v341_v48 }
  0x38   : > { %2844 = vmatprep.mubr.msk.f32.mxu1 %vm3599_vm0, %v3600_v7  ;;  %3384 = vmatpush3.bf16.msra.mxu1 %v3383_v50 }
  0x39   : > { %3390 = vmatpush3.bf16.msra.mxu0 %v3389_v39 }
  0x3a   : > { %2749 = vmatmul.mubr.msk.f32.gmra.mrb[16].mxu0 %vm376_vm1, %v310_v44  ;;  %3391 = vmatprep.subr.bf16.mxu0 %v3598_v4  ;;  %v3392_v44 = vpack.c.bf16 %v1480_v42, %v1479_v41 }
  0x3b   : > { %2751 = vmatprep.mubr.msk.f32.mxu0 %vm3599_vm0, %v3600_v7  ;;  %2845 = vmatmul.mubr.msk.f32.gmra.mrb[16].mxu1 %vm376_vm1, %v342_v51 }
  0x3c   : > { %2847 = vmatprep.mubr.msk.f32.mxu1 %vm3599_vm0, %v3600_v7 }
  0x3d   : > { %3393 = vmatpush3.bf16.msra.mxu0 %v3392_v44 }
  0x3e   : > { %2752 = vmatmul.mubr.msk.f32.gmra.mrb[18].mxu0 %vm376_vm1, %v311_v49  ;;  %3394 = vmatprep.subr.bf16.mxu0 %v3598_v4 }
  0x3f   : > { %2754 = vmatprep.mubr.msk.f32.mxu0 %vm3599_vm0, %v3600_v7  ;;  %2848 = vmatmul.mubr.msk.f32.gmra.mrb[18].mxu1 %vm376_vm1, %v343_v53 }
  0x40   : > { %2850 = vmatprep.mubr.msk.f32.mxu1 %vm3599_vm0, %v3600_v7 }
  0x42   : > { %2755 = vmatmul.mubr.msk.f32.gmra.mrb[20].mxu0 %vm376_vm1, %v312_v52 }
  0x43   : > { %2757 = vmatprep.mubr.msk.f32.mxu0 %vm3599_vm0, %v3600_v7  ;;  %2851 = vmatmul.mubr.msk.f32.gmra.mrb[20].mxu1 %vm376_vm1, %v344_v55 }
  0x44   : > { %2853 = vmatprep.mubr.msk.f32.mxu1 %vm3599_vm0, %v3600_v7 }
  0x46   : > { %2758 = vmatmul.mubr.msk.f32.gmra.mrb[22].mxu0 %vm376_vm1, %v313_v54 }
  0x47   : > { %2760 = vmatprep.mubr.msk.f32.mxu0 %vm3599_vm0, %v3600_v7  ;;  %2854 = vmatmul.mubr.msk.f32.gmra.mrb[22].mxu1 %vm376_vm1, %v345_v57 }
  0x48   : > { %2856 = vmatprep.mubr.msk.f32.mxu1 %vm3599_vm0, %v3600_v7 }
  0x4a   : > { %2761 = vmatmul.mubr.msk.f32.gmra.mrb[24].mxu0 %vm376_vm1, %v314_v56 }
  0x4b   : > { %2763 = vmatprep.mubr.msk.f32.mxu0 %vm3599_vm0, %v3600_v7  ;;  %2857 = vmatmul.mubr.msk.f32.gmra.mrb[24].mxu1 %vm376_vm1, %v346_v59 }
  0x4c   : > { %2859 = vmatprep.mubr.msk.f32.mxu1 %vm3599_vm0, %v3600_v7 }
  0x4e   : > { %2764 = vmatmul.mubr.msk.f32.gmra.mrb[26].mxu0 %vm376_vm1, %v315_v58 }
  0x4f   : > { %2766 = vmatprep.mubr.msk.f32.mxu0 %vm3599_vm0, %v3600_v7  ;;  %2860 = vmatmul.mubr.msk.f32.gmra.mrb[26].mxu1 %vm376_vm1, %v347_v61 }
  0x50   : > { %2862 = vmatprep.mubr.msk.f32.mxu1 %vm3599_vm0, %v3600_v7 }
  0x52   : > { %2767 = vmatmul.mubr.msk.f32.gmra.mrb[28].mxu0 %vm376_vm1, %v316_v60 }
  0x53   : > { %2769 = vmatprep.mubr.msk.f32.mxu0 %vm3599_vm0, %v3600_v7  ;;  %2863 = vmatmul.mubr.msk.f32.gmra.mrb[28].mxu1 %vm376_vm1, %v348_v63  ;;  %v1481_v63 = vld [vmem:[%s4942_s5 + $0x30] sm:$0xff] }
  0x54   : > { %2865 = vmatprep.mubr.msk.f32.mxu1 %vm3599_vm0, %v3600_v7 }
  0x56   : > { %2770 = vmatmul.mubr.msk.f32.gmra.mrb[30].mxu0 %vm376_vm1, %v317_v62 }
  0x57   : > { %2772 = vmatprep.mubr.msk.f32.mxu0 %vm3599_vm0, %v3600_v7  ;;  %2866 = vmatmul.mubr.msk.f32.gmra.mrb[30].mxu1 %vm376_vm1, %v349_v1 }
  0x58   : > { %2868 = vmatprep.mubr.msk.f32.mxu1 %vm3599_vm0, %v3600_v7 }
  0x5a   : > { %2773 = vmatmul.mubr.msk.f32.gmra.mrb[32].mxu0 %vm376_vm1, %v318_v0  ;;  %v1482_v0 = vld [vmem:[%s4942_s5 + $0x38] sm:$0xff] }
  0x5b   : > { %2775 = vmatprep.mubr.msk.f32.mxu0 %vm3599_vm0, %v3600_v7  ;;  %2869 = vmatmul.mubr.msk.f32.gmra.mrb[32].mxu1 %vm376_vm1, %v350_v3  ;;  %v3395_v1 = vpack.c.bf16 %v1482_v0, %v1481_v63 }
  0x5c   : > { %2871 = vmatprep.mubr.msk.f32.mxu1 %vm3599_vm0, %v3600_v7 }
  0x5d   : > { %3396 = vmatpush3.bf16.msra.mxu0 %v3395_v1 }
  0x5e   : > { %2776 = vmatmul.mubr.msk.f32.gmra.mrb[34].mxu0 %vm376_vm1, %v319_v2  ;;  %3397 = vmatprep.subr.bf16.mxu0 %v3598_v4 }
  0x5f   : > { %2778 = vmatprep.mubr.msk.f32.mxu0 %vm3599_vm0, %v3600_v7  ;;  %2872 = vmatmul.mubr.msk.f32.gmra.mrb[34].mxu1 %vm376_vm1, %v351_v6 }
  0x60   : > { %2874 = vmatprep.mubr.msk.f32.mxu1 %vm3599_vm0, %v3600_v7 }
  0x62   : > { %2779 = vmatmul.mubr.msk.f32.gmra.mrb[36].mxu0 %vm376_vm1, %v320_v5 }
  0x63   : > { %2781 = vmatprep.mubr.msk.f32.mxu0 %vm3599_vm0, %v3600_v7  ;;  %2875 = vmatmul.mubr.msk.f32.gmra.mrb[36].mxu1 %vm376_vm1, %v352_v9 }
  0x64   : > { %2877 = vmatprep.mubr.msk.f32.mxu1 %vm3599_vm0, %v3600_v7 }
  0x66   : > { %2782 = vmatmul.mubr.msk.f32.gmra.mrb[38].mxu0 %vm376_vm1, %v321_v8 }
  0x67   : > { %2784 = vmatprep.mubr.msk.f32.mxu0 %vm3599_vm0, %v3600_v7  ;;  %2878 = vmatmul.mubr.msk.f32.gmra.mrb[38].mxu1 %vm376_vm1, %v353_v11 }
  0x68   : > { %2880 = vmatprep.mubr.msk.f32.mxu1 %vm3599_vm0, %v3600_v7 }
  0x6a   : > { %2785 = vmatmul.mubr.msk.f32.gmra.mrb[40].mxu0 %vm376_vm1, %v322_v10 }
  0x6b   : > { %2787 = vmatprep.mubr.msk.f32.mxu0 %vm3599_vm0, %v3600_v7  ;;  %2881 = vmatmul.mubr.msk.f32.gmra.mrb[40].mxu1 %vm376_vm1, %v354_v13 }
  0x6c   : > { %2883 = vmatprep.mubr.msk.f32.mxu1 %vm3599_vm0, %v3600_v7 }
  0x6e   : > { %2788 = vmatmul.mubr.msk.f32.gmra.mrb[42].mxu0 %vm376_vm1, %v323_v12 }
  0x6f   : > { %2790 = vmatprep.mubr.msk.f32.mxu0 %vm3599_vm0, %v3600_v7  ;;  %2884 = vmatmul.mubr.msk.f32.gmra.mrb[42].mxu1 %vm376_vm1, %v355_v15 }
  0x70   : > { %2886 = vmatprep.mubr.msk.f32.mxu1 %vm3599_vm0, %v3600_v7 }
  0x72   : > { %2791 = vmatmul.mubr.msk.f32.gmra.mrb[44].mxu0 %vm376_vm1, %v324_v14 }
  0x73   : > { %2793 = vmatprep.mubr.msk.f32.mxu0 %vm3599_vm0, %v3600_v7  ;;  %2887 = vmatmul.mubr.msk.f32.gmra.mrb[44].mxu1 %vm376_vm1, %v356_v17 }
  0x74   : > { %2889 = vmatprep.mubr.msk.f32.mxu1 %vm3599_vm0, %v3600_v7 }
  0x76   : > { %2794 = vmatmul.mubr.msk.f32.gmra.mrb[46].mxu0 %vm376_vm1, %v325_v16 }
  0x77   : > { %2796 = vmatprep.mubr.msk.f32.mxu0 %vm3599_vm0, %v3600_v7  ;;  %2890 = vmatmul.mubr.msk.f32.gmra.mrb[46].mxu1 %vm376_vm1, %v357_v19 }
  0x78   : > { %2892 = vmatprep.mubr.msk.f32.mxu1 %vm3599_vm0, %v3600_v7 }
  0x7a   : > { %2797 = vmatmul.mubr.msk.f32.gmra.mrb[48].mxu0 %vm376_vm1, %v326_v18 }
  0x7b   : > { %2799 = vmatprep.mubr.msk.f32.mxu0 %vm3599_vm0, %v3600_v7  ;;  %2893 = vmatmul.mubr.msk.f32.gmra.mrb[48].mxu1 %vm376_vm1, %v358_v21 }
  0x7c   : > { %2895 = vmatprep.mubr.msk.f32.mxu1 %vm3599_vm0, %v3600_v7 }
  0x7e   : > { %2800 = vmatmul.mubr.msk.f32.gmra.mrb[50].mxu0 %vm376_vm1, %v327_v20 }
  0x7f   : > { %2802 = vmatprep.mubr.msk.f32.mxu0 %vm3599_vm0, %v3600_v7  ;;  %2896 = vmatmul.mubr.msk.f32.gmra.mrb[50].mxu1 %vm376_vm1, %v359_v23 }
  0x80   : > { %2898 = vmatprep.mubr.msk.f32.mxu1 %vm3599_vm0, %v3600_v7 }
  0x82   : > { %2803 = vmatmul.mubr.msk.f32.gmra.mrb[52].mxu0 %vm376_vm1, %v328_v22 }
  0x83   : > { %2805 = vmatprep.mubr.msk.f32.mxu0 %vm3599_vm0, %v3600_v7  ;;  %2899 = vmatmul.mubr.msk.f32.gmra.mrb[52].mxu1 %vm376_vm1, %v360_v25 }
  0x84   : > { %2901 = vmatprep.mubr.msk.f32.mxu1 %vm3599_vm0, %v3600_v7 }
  0x86   : > { %2806 = vmatmul.mubr.msk.f32.gmra.mrb[54].mxu0 %vm376_vm1, %v329_v24 }
  0x87   : > { %2808 = vmatprep.mubr.msk.f32.mxu0 %vm3599_vm0, %v3600_v7  ;;  %2902 = vmatmul.mubr.msk.f32.gmra.mrb[54].mxu1 %vm376_vm1, %v361_v27 }
  0x88   : > { %2904 = vmatprep.mubr.msk.f32.mxu1 %vm3599_vm0, %v3600_v7 }
  0x8a   : > { %2809 = vmatmul.mubr.msk.f32.gmra.mrb[56].mxu0 %vm376_vm1, %v330_v26 }
  0x8b   : > { %2811 = vmatprep.mubr.msk.f32.mxu0 %vm3599_vm0, %v3600_v7  ;;  %2905 = vmatmul.mubr.msk.f32.gmra.mrb[56].mxu1 %vm376_vm1, %v362_v29  ;;  %v1484_v29 = vld [vmem:[%s4942_s5 + $0x48] sm:$0xff] }
  0x8c   : > { %2907 = vmatprep.mubr.msk.f32.mxu1 %vm3599_vm0, %v3600_v7 }
  0x8e   : > { %2812 = vmatmul.mubr.msk.f32.gmra.mrb[58].mxu0 %vm376_vm1, %v331_v28  ;;  %v1483_v28 = vld [vmem:[%s4942_s5 + $0x40] sm:$0xff] }
  0x8f   : > { %2814 = vmatprep.mubr.msk.f32.mxu0 %vm3599_vm0, %v3600_v7  ;;  %2908 = vmatmul.mubr.msk.f32.gmra.mrb[58].mxu1 %vm376_vm1, %v363_v31 }
  0x90   : > { %2910 = vmatprep.mubr.msk.f32.mxu1 %vm3599_vm0, %v3600_v7 }
  0x92   : > { %2815 = vmatmul.mubr.msk.f32.gmra.mrb[60].mxu0 %vm376_vm1, %v332_v30  ;;  %v3398_v30 = vpack.c.bf16 %v1484_v29, %v1483_v28  ;;  %v1488_v28 = vld [vmem:[%s4942_s5 + $0x68] sm:$0xff] }
  0x93   : > { %2817 = vmatprep.mubr.msk.f32.mxu0 %vm3599_vm0, %v3600_v7  ;;  %2911 = vmatmul.mubr.msk.f32.gmra.mrb[60].mxu1 %vm376_vm1, %v364_v33 }
  0x94   : > { %2945 = vmatprep.mubr.msk.f32.mxu1 %vm3599_vm0, %v3600_v7  ;;  %3399 = vmatpush3.bf16.msra.mxu0 %v3398_v30 }
  0x95   : > { %3400 = vmatprep.subr.bf16.mxu0 %v3598_v4 }
  0x96   : > { %2818 = vmatmul.mubr.msk.f32.gmra.mrb[62].mxu0 %vm376_vm1, %v333_v32 }
  0x97   : > { %3166 = vmatprep.mubr.msk.f32.mxu0 %vm3599_vm0, %v3600_v7 }
  0xed   : > { %v632_v43 = vpop.f32.mrb[0].mxu0 }
  0xee   : > { %v633_v45 = vadd.f32 %v4029_v40, %v632_v43  ;;  %v2726_v46 = vpop.f32.mrb[1].mxu0  ;;  %v4042_v52 = vpop.f32.mrb[0].mxu1 }
  0xef   : > { %v2822_v54 = vpop.f32.mrb[1].mxu1 }
  0xf0   : > { %v946_v47 = vmax.f32 %v633_v45, 0.0 }
  0xf1   : > { %v637_v48 = vpop.f32.mrb[2].mxu0 }
  0xf2   : > { %v638_v49 = vadd.f32 %v4029_v40, %v637_v48  ;;  %v2729_v50 = vpop.f32.mrb[3].mxu0  ;;  %2946 = vmatmul.mubr.f32.vlgmr.msra.gmra.mrb[62].mxu1 %v946_v47  ;;  %v4047_v58 = vpop.f32.mrb[2].mxu1 }
  0xf3   : > { %2948 = vmatprep.mubr.msk.f32.mxu1 %vm3599_vm0, %v3600_v7  ;;  %v2825_v60 = vpop.f32.mrb[3].mxu1 }
  0xf4   : > { %v947_v51 = vmax.f32 %v638_v49, 0.0 }
  0xf5   : > { %v642_v53 = vpop.f32.mrb[4].mxu0 }
  0xf6   : > { %v643_v55 = vadd.f32 %v4029_v40, %v642_v53  ;;  %v2732_v56 = vpop.f32.mrb[5].mxu0  ;;  %2949 = vmatmul.mubr.f32.gmra.mrb[64].mxu1 %v947_v51  ;;  %v4058_v3 = vpop.f32.mrb[4].mxu1 }
  0xf7   : > { %2951 = vmatprep.mubr.msk.f32.mxu1 %vm3599_vm0, %v3600_v7  ;;  %v2828_v6 = vpop.f32.mrb[5].mxu1 }
  0xf8   : > { %v948_v57 = vmax.f32 %v643_v55, 0.0 }
  0xf9   : > { %v647_v59 = vpop.f32.mrb[6].mxu0 }
  0xfa   : > { %v648_v61 = vadd.f32 %v4029_v40, %v647_v59  ;;  %v2735_v62 = vpop.f32.mrb[7].mxu0  ;;  %2952 = vmatmul.mubr.f32.gmra.mrb[66].mxu1 %v948_v57  ;;  %v4064_v11 = vpop.f32.mrb[6].mxu1  ;;  %v1485_v57 = vld [vmem:[%s4942_s5 + $0x50] sm:$0xff]  ;;  %v1486_v59 = vld [vmem:[%s4942_s5 + $0x58] sm:$0xff] }
  0xfb   : > { %2954 = vmatprep.mubr.msk.f32.mxu1 %vm3599_vm0, %v3600_v7  ;;  %v2831_v13 = vpop.f32.mrb[7].mxu1  ;;  %v3401_v60 = vpack.c.bf16 %v1486_v59, %v1485_v57 }
  0xfc   : > { %v949_v2 = vmax.f32 %v648_v61, 0.0 }
  0xfd   : > { %v652_v5 = vpop.f32.mrb[8].mxu0  ;;  %3402 = vmatpush3.bf16.msra.mxu0 %v3401_v60  ;;  %v1489_v60 = vld [vmem:[%s4942_s5 + $0x70] sm:$0xff] }
  0xfe   : > { %v653_v8 = vadd.f32 %v4029_v40, %v652_v5  ;;  %v2738_v9 = vpop.f32.mrb[9].mxu0  ;;  %2955 = vmatmul.mubr.f32.gmra.mrb[68].mxu1 %v949_v2  ;;  %v4069_v17 = vpop.f32.mrb[8].mxu1  ;;  %3403 = vmatprep.subr.bf16.mxu0 %v3598_v4 }
  0xff   : > { %2957 = vmatprep.mubr.msk.f32.mxu1 %vm3599_vm0, %v3600_v7  ;;  %v2834_v19 = vpop.f32.mrb[9].mxu1 }
 0x100   : > { %v950_v10 = vmax.f32 %v653_v8, 0.0 }
 0x101   : > { %v657_v12 = vpop.f32.mrb[10].mxu0 }
 0x102   : > { %v658_v14 = vadd.f32 %v4029_v40, %v657_v12  ;;  %v2741_v15 = vpop.f32.mrb[11].mxu0  ;;  %2958 = vmatmul.mubr.f32.gmra.mrb[70].mxu1 %v950_v10  ;;  %v4074_v23 = vpop.f32.mrb[10].mxu1 }
 0x103   : > { %2960 = vmatprep.mubr.msk.f32.mxu1 %vm3599_vm0, %v3600_v7  ;;  %v2837_v25 = vpop.f32.mrb[11].mxu1 }
 0x104   : > { %v951_v16 = vmax.f32 %v658_v14, 0.0 }
 0x105   : > { %v662_v18 = vpop.f32.mrb[12].mxu0 }
 0x106   : > { %v663_v20 = vadd.f32 %v4029_v40, %v662_v18  ;;  %v2744_v21 = vpop.f32.mrb[13].mxu0  ;;  %2961 = vmatmul.mubr.f32.gmra.mrb[72].mxu1 %v951_v16  ;;  %v4085_v32 = vpop.f32.mrb[12].mxu1 }
 0x107   : > { %2963 = vmatprep.mubr.msk.f32.mxu1 %vm3599_vm0, %v3600_v7  ;;  %v2840_v34 = vpop.f32.mrb[13].mxu1 }
 0x108   : > { %v952_v22 = vmax.f32 %v663_v20, 0.0 }
 0x109   : > { %v667_v24 = vpop.f32.mrb[14].mxu0 }
 0x10a   : > { %v668_v26 = vadd.f32 %v4029_v40, %v667_v24  ;;  %v2747_v27 = vpop.f32.mrb[15].mxu0  ;;  %2964 = vmatmul.mubr.f32.gmra.mrb[74].mxu1 %v952_v22  ;;  %v4091_v38 = vpop.f32.mrb[14].mxu1 }
 0x10b   : > { %2966 = vmatprep.mubr.msk.f32.mxu1 %vm3599_vm0, %v3600_v7  ;;  %v2843_v41 = vpop.f32.mrb[15].mxu1  ;;  %v1487_v27 = vld [vmem:[%s4942_s5 + $0x60] sm:$0xff] }
 0x10c   : > { %v953_v31 = vmax.f32 %v668_v26, 0.0  ;;  %v3404_v29 = vpack.c.bf16 %v1488_v28, %v1487_v27 }
 0x10d   : > { %v672_v33 = vpop.f32.mrb[16].mxu0 }
 0x10e   : > { %v673_v35 = vadd.f32 %v4029_v40, %v672_v33  ;;  %v2750_v36 = vpop.f32.mrb[17].mxu0  ;;  %2967 = vmatmul.mubr.f32.gmra.mrb[76].mxu1 %v953_v31  ;;  %v4096_v45 = vpop.f32.mrb[16].mxu1  ;;  %3405 = vmatpush3.bf16.msra.mxu0 %v3404_v29 }
 0x10f   : > { %2969 = vmatprep.mubr.msk.f32.mxu1 %vm3599_vm0, %v3600_v7  ;;  %v2846_v47 = vpop.f32.mrb[17].mxu1  ;;  %3406 = vmatprep.subr.bf16.mxu0 %v3598_v4 }
 0x110   : > { %v954_v37 = vmax.f32 %v673_v35, 0.0 }
 0x111   : > { %v677_v39 = vpop.f32.mrb[18].mxu0 }
 0x112   : > { %v678_v42 = vadd.f32 %v4029_v40, %v677_v39  ;;  %v2753_v43 = vpop.f32.mrb[19].mxu0  ;;  %2970 = vmatmul.mubr.f32.gmra.mrb[78].mxu1 %v954_v37  ;;  %v4101_v51 = vpop.f32.mrb[18].mxu1 }
 0x113   : > { %2972 = vmatprep.mubr.msk.f32.mxu1 %vm3599_vm0, %v3600_v7  ;;  %v2849_v54 = vpop.f32.mrb[19].mxu1 }
 0x114   : > { %v955_v44 = vmax.f32 %v678_v42, 0.0 }
 0x115   : > { %v682_v46 = vpop.f32.mrb[20].mxu0 }
 0x116   : > { %v683_v48 = vadd.f32 %v4029_v40, %v682_v46  ;;  %v2756_v49 = vpop.f32.mrb[21].mxu0  ;;  %2973 = vmatmul.mubr.f32.gmra.mrb[80].mxu1 %v955_v44  ;;  %v4112_v62 = vpop.f32.mrb[20].mxu1 }
 0x117   : > { %2975 = vmatprep.mubr.msk.f32.mxu1 %vm3599_vm0, %v3600_v7  ;;  %v2852_v0 = vpop.f32.mrb[21].mxu1 }
 0x118   : > { %v956_v50 = vmax.f32 %v683_v48, 0.0 }
 0x119   : > { %v687_v53 = vpop.f32.mrb[22].mxu0 }
 0x11a   : > { %v688_v55 = vadd.f32 %v4029_v40, %v687_v53  ;;  %v2759_v56 = vpop.f32.mrb[23].mxu0  ;;  %2976 = vmatmul.mubr.f32.gmra.mrb[82].mxu1 %v956_v50  ;;  %v4118_v6 = vpop.f32.mrb[22].mxu1 }
 0x11b   : > { %2978 = vmatprep.mubr.msk.f32.mxu1 %vm3599_vm0, %v3600_v7  ;;  %v2855_v9 = vpop.f32.mrb[23].mxu1 }
 0x11c   : > { %v957_v61 = vmax.f32 %v688_v55, 0.0 }
 0x11d   : > { %v692_v63 = vpop.f32.mrb[24].mxu0 }
 0x11e   : > { %v693_v1 = vadd.f32 %v4029_v40, %v692_v63  ;;  %v2762_v2 = vpop.f32.mrb[25].mxu0  ;;  %2979 = vmatmul.mubr.f32.gmra.mrb[84].mxu1 %v957_v61  ;;  %v4123_v14 = vpop.f32.mrb[24].mxu1  ;;  %v1490_v61 = vld [vmem:[%s4942_s5 + $0x78] sm:$0xff] }
 0x11f   : > { %2981 = vmatprep.mubr.msk.f32.mxu1 %vm3599_vm0, %v3600_v7  ;;  %v2858_v16 = vpop.f32.mrb[25].mxu1  ;;  %v3407_v63 = vpack.c.bf16 %v1490_v61, %v1489_v60 }
 0x120   : > { %v958_v5 = vmax.f32 %v693_v1, 0.0 }
 0x121   : > { %v697_v8 = vpop.f32.mrb[26].mxu0  ;;  %3408 = vmatpush3.bf16.msra.mxu0 %v3407_v63 }
 0x122   : > { %v698_v10 = vadd.f32 %v4029_v40, %v697_v8  ;;  %v2765_v12 = vpop.f32.mrb[27].mxu0  ;;  %2982 = vmatmul.mubr.f32.gmra.mrb[86].mxu1 %v958_v5  ;;  %v4128_v21 = vpop.f32.mrb[26].mxu1 }
 0x123   : > { %2984 = vmatprep.mubr.msk.f32.mxu1 %vm3599_vm0, %v3600_v7  ;;  %v2861_v24 = vpop.f32.mrb[27].mxu1 }
 0x124   : > { %v959_v13 = vmax.f32 %v698_v10, 0.0 }
 0x125   : > { %v702_v15 = vpop.f32.mrb[28].mxu0 }
 0x126   : > { %v703_v18 = vadd.f32 %v4029_v40, %v702_v15  ;;  %v2768_v19 = vpop.f32.mrb[29].mxu0  ;;  %2985 = vmatmul.mubr.f32.gmra.mrb[88].mxu1 %v959_v13  ;;  %v4139_v31 = vpop.f32.mrb[28].mxu1 }
 0x127   : > { %2987 = vmatprep.mubr.msk.f32.mxu1 %vm3599_vm0, %v3600_v7  ;;  %v2864_v34 = vpop.f32.mrb[29].mxu1 }
 0x128   : > { %v960_v20 = vmax.f32 %v703_v18, 0.0 }
 0x129   : > { %v707_v22 = vpop.f32.mrb[30].mxu0 }
 0x12a   : > { %v708_v25 = vadd.f32 %v4029_v40, %v707_v22  ;;  %v2771_v26 = vpop.f32.mrb[31].mxu0  ;;  %2988 = vmatmul.mubr.f32.gmra.mrb[90].mxu1 %v960_v20  ;;  %v4145_v39 = vpop.f32.mrb[30].mxu1 }
 0x12b   : > { %2990 = vmatprep.mubr.msk.f32.mxu1 %vm3599_vm0, %v3600_v7  ;;  %v2867_v42 = vpop.f32.mrb[31].mxu1 }
 0x12c   : > { %v961_v30 = vmax.f32 %v708_v25, 0.0 }
 0x12d   : > { %v712_v33 = vpop.f32.mrb[32].mxu0 }
 0x12e   : > { %v713_v35 = vadd.f32 %v4029_v40, %v712_v33  ;;  %v2774_v36 = vpop.f32.mrb[33].mxu0  ;;  %2991 = vmatmul.mubr.f32.gmra.mrb[92].mxu1 %v961_v30  ;;  %v4150_v47 = vpop.f32.mrb[32].mxu1 }
 0x12f   : > { %2993 = vmatprep.mubr.msk.f32.mxu1 %vm3599_vm0, %v3600_v7  ;;  %v2870_v4 = vpop.f32.mrb[33].mxu1 }
 0x130   : > { %v962_v37 = vmax.f32 %v713_v35, 0.0 }
 0x131   : > { %v717_v41 = vpop.f32.mrb[34].mxu0 }
 0x132   : > { %v718_v43 = vadd.f32 %v4029_v40, %v717_v41  ;;  %v2777_v44 = vpop.f32.mrb[35].mxu0  ;;  %2994 = vmatmul.mubr.f32.gmra.mrb[94].mxu1 %v962_v37  ;;  %v4155_v54 = vpop.f32.mrb[34].mxu1 }
 0x133   : > { %2996 = vmatprep.mubr.msk.f32.mxu1 %vm3599_vm0, %v3600_v7  ;;  %v2873_v56 = vpop.f32.mrb[35].mxu1 }
 0x134   : > { %v963_v46 = vmax.f32 %v718_v43, 0.0 }
 0x135   : > { %v722_v48 = vpop.f32.mrb[36].mxu0 }
 0x136   : > { %v723_v49 = vadd.f32 %v4029_v40, %v722_v48  ;;  %v2780_v50 = vpop.f32.mrb[37].mxu0  ;;  %2997 = vmatmul.mubr.f32.gmra.mrb[96].mxu1 %v963_v46  ;;  %v4166_v1 = vpop.f32.mrb[36].mxu1 }
 0x137   : > { %2999 = vmatprep.mubr.msk.f32.mxu1 %vm3599_vm0, %v3600_v7  ;;  %v2876_v5 = vpop.f32.mrb[37].mxu1 }
 0x138   : > { %v964_v53 = vmax.f32 %v723_v49, 0.0 }
 0x139   : > { %v727_v55 = vpop.f32.mrb[38].mxu0 }
 0x13a   : > { %v728_v57 = vadd.f32 %v4029_v40, %v727_v55  ;;  %v2783_v59 = vpop.f32.mrb[39].mxu0  ;;  %3000 = vmatmul.mubr.f32.gmra.mrb[98].mxu1 %v964_v53  ;;  %v4171_v12 = vpop.f32.mrb[38].mxu1 }
 0x13b   : > { %3002 = vmatprep.mubr.msk.f32.mxu1 %vm3599_vm0, %v3600_v7  ;;  %v2879_v15 = vpop.f32.mrb[39].mxu1 }
 0x13c   : > { %v965_v0 = vmax.f32 %v728_v57, 0.0 }
 0x13d   : > { %v732_v2 = vpop.f32.mrb[40].mxu0 }
 0x13e   : > { %v733_v8 = vadd.f32 %v4029_v40, %v732_v2  ;;  %v2786_v9 = vpop.f32.mrb[41].mxu0  ;;  %3003 = vmatmul.mubr.f32.gmra.mrb[100].mxu1 %v965_v0  ;;  %v4176_v20 = vpop.f32.mrb[40].mxu1 }
 0x13f   : > { %3005 = vmatprep.mubr.msk.f32.mxu1 %vm3599_vm0, %v3600_v7  ;;  %v2882_v24 = vpop.f32.mrb[41].mxu1 }
 0x140   : > { %v966_v10 = vmax.f32 %v733_v8, 0.0 }
 0x141   : > { %v737_v13 = vpop.f32.mrb[42].mxu0 }
 0x142   : > { %v738_v16 = vadd.f32 %v4029_v40, %v737_v13  ;;  %v2789_v18 = vpop.f32.mrb[43].mxu0  ;;  %3006 = vmatmul.mubr.f32.gmra.mrb[102].mxu1 %v966_v10  ;;  %v4181_v28 = vpop.f32.mrb[42].mxu1 }
 0x143   : > { %3008 = vmatprep.mubr.msk.f32.mxu1 %vm3599_vm0, %v3600_v7  ;;  %v2885_v30 = vpop.f32.mrb[43].mxu1 }
 0x144   : > { %v967_v19 = vmax.f32 %v738_v16, 0.0 }
 0x145   : > { %v742_v22 = vpop.f32.mrb[44].mxu0 }
 0x146   : > { %v743_v25 = vadd.f32 %v4029_v40, %v742_v22  ;;  %v2792_v26 = vpop.f32.mrb[45].mxu0  ;;  %3009 = vmatmul.mubr.f32.gmra.mrb[104].mxu1 %v967_v19  ;;  %v4186_v36 = vpop.f32.mrb[44].mxu1 }
 0x147   : > { %3011 = vmatprep.mubr.msk.f32.mxu1 %vm3599_vm0, %v3600_v7  ;;  %v2888_v41 = vpop.f32.mrb[45].mxu1 }
 0x148   : > { %v968_v27 = vmax.f32 %v743_v25, 0.0 }
 0x149   : > { %v747_v29 = vpop.f32.mrb[46].mxu0 }
 0x14a   : > { %v748_v33 = vadd.f32 %v4029_v40, %v747_v29  ;;  %v2795_v34 = vpop.f32.mrb[47].mxu0  ;;  %3012 = vmatmul.mubr.f32.gmra.mrb[106].mxu1 %v968_v27  ;;  %v4191_v46 = vpop.f32.mrb[46].mxu1 }
 0x14b   : > { %3014 = vmatprep.mubr.msk.f32.mxu1 %vm3599_vm0, %v3600_v7  ;;  %v2891_v4 = vpop.f32.mrb[47].mxu1 }
 0x14c   : > { %v969_v35 = vmax.f32 %v748_v33, 0.0 }
 0x14d   : > { %v752_v37 = vpop.f32.mrb[48].mxu0 }
 0x14e   : > { %v753_v42 = vadd.f32 %v4029_v40, %v752_v37  ;;  %v2798_v43 = vpop.f32.mrb[49].mxu0  ;;  %3015 = vmatmul.mubr.f32.gmra.mrb[108].mxu1 %v969_v35  ;;  %v4196_v55 = vpop.f32.mrb[48].mxu1 }
 0x14f   : > { %3017 = vmatprep.mubr.msk.f32.mxu1 %vm3599_vm0, %v3600_v7  ;;  %v2894_v57 = vpop.f32.mrb[49].mxu1 }
 0x150   : > { %v970_v44 = vmax.f32 %v753_v42, 0.0 }
 0x151   : > { %v757_v48 = vpop.f32.mrb[50].mxu0 }
 0x152   : > { %v758_v49 = vadd.f32 %v4029_v40, %v757_v48  ;;  %v2801_v50 = vpop.f32.mrb[51].mxu0  ;;  %3018 = vmatmul.mubr.f32.gmra.mrb[110].mxu1 %v970_v44  ;;  %v4201_v63 = vpop.f32.mrb[50].mxu1 }
 0x153   : > { %3020 = vmatprep.mubr.msk.f32.mxu1 %vm3599_vm0, %v3600_v7  ;;  %v2897_v2 = vpop.f32.mrb[51].mxu1 }
 0x154   : > { %v971_v53 = vmax.f32 %v758_v49, 0.0  ;;  %v793_v49 = vadd.f32 %v4029_v40, %v4042_v52  ;;  %v803_v52 = vadd.f32 %v4029_v40, %v4058_v3  ;;  %v813_v2 = vadd.f32 %v4029_v40, %v4069_v17 }
 0x155   : > { %v762_v56 = vpop.f32.mrb[52].mxu0 }
 0x156   : > { %v763_v59 = vadd.f32 %v4029_v40, %v762_v56  ;;  %v2804_v60 = vpop.f32.mrb[53].mxu0  ;;  %3021 = vmatmul.mubr.f32.gmra.mrb[112].mxu1 %v971_v53  ;;  %v4206_v10 = vpop.f32.mrb[52].mxu1  ;;  %v978_v57 = vmax.f32 %v793_v49, 0.0  ;;  %v982_v3 = vmax.f32 %v813_v2, 0.0 }
 0x157   : > { %3023 = vmatprep.mubr.msk.f32.mxu1 %vm3599_vm0, %v3600_v7  ;;  %v2900_v15 = vpop.f32.mrb[53].mxu1 }
 0x158   : > { %v972_v61 = vmax.f32 %v763_v59, 0.0  ;;  %v798_v59 = vadd.f32 %v4029_v40, %v4047_v58  ;;  %v838_v15 = vadd.f32 %v4029_v40, %v4101_v51 }
 0x159   : > { %v767_v0 = vpop.f32.mrb[54].mxu0 }
 0x15a   : > { %v768_v5 = vadd.f32 %v4029_v40, %v767_v0  ;;  %v2807_v8 = vpop.f32.mrb[55].mxu0  ;;  %3024 = vmatmul.mubr.f32.gmra.mrb[114].mxu1 %v972_v61  ;;  %v4211_v22 = vpop.f32.mrb[54].mxu1  ;;  %v979_v60 = vmax.f32 %v798_v59, 0.0  ;;  %v980_v61 = vmax.f32 %v803_v52, 0.0  ;;  %v808_v0 = vadd.f32 %v4029_v40, %v4064_v11 }
 0x15b   : > { %3026 = vmatprep.mubr.msk.f32.mxu1 %vm3599_vm0, %v3600_v7  ;;  %v2903_v25 = vpop.f32.mrb[55].mxu1  ;;  %v823_v8 = vadd.f32 %v4029_v40, %v4085_v32  ;;  %v913_v59 = vadd.f32 %v4029_v40, %v4196_v55 }
 0x15c   : > { %v973_v9 = vmax.f32 %v768_v5, 0.0  ;;  %v981_v58 = vmax.f32 %v808_v0, 0.0  ;;  %v818_v5 = vadd.f32 %v4029_v40, %v4074_v23  ;;  %v863_v25 = vadd.f32 %v4029_v40, %v4139_v31 }
 0x15d   : > { %v772_v13 = vpop.f32.mrb[56].mxu0  ;;  %v984_v17 = vmax.f32 %v823_v8, 0.0  ;;  %v1002_v0 = vmax.f32 %v913_v59, 0.0  ;;  %v923_v8 = vadd.f32 %v4029_v40, %v4206_v10 }
 0x15e   : > { %v773_v16 = vadd.f32 %v4029_v40, %v772_v13  ;;  %v2810_v18 = vpop.f32.mrb[57].mxu0  ;;  %3027 = vmatmul.mubr.f32.gmra.mrb[116].mxu1 %v973_v9  ;;  %v4216_v30 = vpop.f32.mrb[56].mxu1  ;;  %v983_v11 = vmax.f32 %v818_v5, 0.0  ;;  %v828_v9 = vadd.f32 %v4029_v40, %v4091_v38  ;;  %v833_v13 = vadd.f32 %v4029_v40, %v4096_v45 }
 0x15f   : > { %3029 = vmatprep.mubr.msk.f32.mxu1 %vm3599_vm0, %v3600_v7  ;;  %v2906_v34 = vpop.f32.mrb[57].mxu1  ;;  %v987_v38 = vmax.f32 %v838_v15, 0.0  ;;  %v848_v18 = vadd.f32 %v4029_v40, %v4118_v6 }
 0x160   : > { %v974_v19 = vmax.f32 %v773_v16, 0.0  ;;  %v985_v23 = vmax.f32 %v828_v9, 0.0  ;;  %v986_v32 = vmax.f32 %v833_v13, 0.0  ;;  %v843_v16 = vadd.f32 %v4029_v40, %v4112_v62 }
 0x161   : > { %v777_v24 = vpop.f32.mrb[58].mxu0  ;;  %v989_v51 = vmax.f32 %v848_v18, 0.0  ;;  %v888_v34 = vadd.f32 %v4029_v40, %v4171_v12  ;;  %v4317_v12 = vld [vmem:[%s4941_s4] ss:$0 sm:$0xff]  ;;  %v1004_v13 = vmax.f32 %v923_v8, 0.0  ;;  %v933_v18 = vadd.f32 %v4029_v40, %v4216_v30 }
 0x162   : > { %v778_v26 = vadd.f32 %v4029_v40, %v777_v24  ;;  %v2813_v27 = vpop.f32.mrb[59].mxu0  ;;  %3030 = vmatmul.mubr.f32.gmra.mrb[118].mxu1 %v974_v19  ;;  %v4221_v42 = vpop.f32.mrb[58].mxu1  ;;  %v988_v45 = vmax.f32 %v843_v16, 0.0  ;;  %v853_v19 = vadd.f32 %v4029_v40, %v4123_v14  ;;  %v858_v24 = vadd.f32 %v4029_v40, %v4128_v21 }
 0x163   : > { %3032 = vmatprep.mubr.msk.f32.mxu1 %vm3599_vm0, %v3600_v7  ;;  %v2909_v44 = vpop.f32.mrb[59].mxu1  ;;  %v992_v14 = vmax.f32 %v863_v25, 0.0  ;;  %v873_v27 = vadd.f32 %v4029_v40, %v4150_v47 }
 0x164   : > { %v975_v29 = vmax.f32 %v778_v26, 0.0  ;;  %v990_v62 = vmax.f32 %v853_v19, 0.0  ;;  %v991_v6 = vmax.f32 %v858_v24, 0.0  ;;  %v868_v26 = vadd.f32 %v4029_v40, %v4145_v39 }
 0x165   : > { %v782_v33 = vpop.f32.mrb[60].mxu0  ;;  %v994_v31 = vmax.f32 %v873_v27, 0.0  ;;  %v1006_v24 = vmax.f32 %v933_v18, 0.0 }
 0x166   : > { %v783_v35 = vadd.f32 %v4029_v40, %v782_v33  ;;  %v2816_v37 = vpop.f32.mrb[61].mxu0  ;;  %3033 = vmatmul.mubr.f32.gmra.mrb[120].mxu1 %v975_v29  ;;  %v4228_v53 = vpop.f32.mrb[60].mxu1  ;;  %v993_v21 = vmax.f32 %v868_v26, 0.0  ;;  %v878_v29 = vadd.f32 %v4029_v40, %v4155_v54  ;;  %v883_v33 = vadd.f32 %v4029_v40, %v4166_v1 }
 0x167   : > { %3035 = vmatprep.mubr.msk.f32.mxu1 %vm3599_vm0, %v3600_v7  ;;  %v2912_v56 = vpop.f32.mrb[61].mxu1  ;;  %v997_v54 = vmax.f32 %v888_v34, 0.0  ;;  %v898_v37 = vadd.f32 %v4029_v40, %v4181_v28  ;;  %v943_v27 = vadd.f32 %v4029_v40, %v4228_v53 }
 0x168   : > { %v976_v41 = vmax.f32 %v783_v35, 0.0  ;;  %v995_v39 = vmax.f32 %v878_v29, 0.0  ;;  %v996_v47 = vmax.f32 %v883_v33, 0.0  ;;  %v893_v35 = vadd.f32 %v4029_v40, %v4176_v20 }
 0x169   : > { %v787_v43 = vpop.f32.mrb[62].mxu0  ;;  %v903_v20 = vadd.f32 %v4029_v40, %v4186_v36  ;;  %v1008_v33 = vmax.f32 %v943_v27, 0.0 }
 0x16a   : > { %v788_v48 = vadd.f32 %v4029_v40, %v787_v43  ;;  %v2819_v4 = vpop.f32.mrb[63].mxu0  ;;  %3036 = vmatmul.mubr.f32.gmra.mrb[122].mxu1 %v976_v41  ;;  %v998_v1 = vmax.f32 %v893_v35, 0.0  ;;  %v999_v41 = vmax.f32 %v898_v37, 0.0 }
 0x16b   : > { %3038 = vmatprep.mubr.msk.f32.mxu1 %vm3599_vm0, %v3600_v7  ;;  %v1000_v28 = vmax.f32 %v903_v20, 0.0  ;;  %v908_v4 = vadd.f32 %v4029_v40, %v4191_v46 }
 0x16c   : > { %v977_v50 = vmax.f32 %v788_v48, 0.0 }
 0x16d   : > { %v1001_v36 = vmax.f32 %v908_v4, 0.0 }
 0x16e   : > { %3039 = vmatmul.mubr.f32.gmra.mrb[124].mxu1 %v977_v50 }
 0x16f   : > { %3041 = vmatprep.mubr.msk.f32.mxu1 %vm3599_vm0, %v3600_v7 }
 0x172   : > { %3042 = vmatmul.mubr.f32.gmra.mrb[126].mxu1 %v978_v57 }
 0x173   : > { %3044 = vmatprep.mubr.msk.f32.mxu1 %vm3599_vm0, %v3600_v7 }
 0x176   : > { %3045 = vmatmul.mubr.f32.gmra.mrb[128].mxu1 %v979_v60 }
 0x177   : > { %3047 = vmatprep.mubr.msk.f32.mxu1 %vm3599_vm0, %v3600_v7 }
 0x17a   : > { %3048 = vmatmul.mubr.f32.gmra.mrb[130].mxu1 %v980_v61 }
 0x17b   : > { %3050 = vmatprep.mubr.msk.f32.mxu1 %vm3599_vm0, %v3600_v7 }
 0x17e   : > { %3051 = vmatmul.mubr.f32.gmra.mrb[132].mxu1 %v981_v58  ;;  %v918_v58 = vadd.f32 %v4029_v40, %v4201_v63 }
 0x17f   : > { %3053 = vmatprep.mubr.msk.f32.mxu1 %vm3599_vm0, %v3600_v7 }
 0x182   : > { %3054 = vmatmul.mubr.f32.gmra.mrb[134].mxu1 %v982_v3 }
 0x183   : > { %3056 = vmatprep.mubr.msk.f32.mxu1 %vm3599_vm0, %v3600_v7 }
 0x186   : > { %3057 = vmatmul.mubr.f32.gmra.mrb[136].mxu1 %v983_v11  ;;  %v1003_v11 = vmax.f32 %v918_v58, 0.0 }
 0x187   : > { %3059 = vmatprep.mubr.msk.f32.mxu1 %vm3599_vm0, %v3600_v7 }
 0x18a   : > { %3060 = vmatmul.mubr.f32.gmra.mrb[138].mxu1 %v984_v17 }
 0x18b   : > { %3062 = vmatprep.mubr.msk.f32.mxu1 %vm3599_vm0, %v3600_v7 }
 0x18e   : > { %3063 = vmatmul.mubr.f32.gmra.mrb[140].mxu1 %v985_v23 }
 0x18f   : > { %3065 = vmatprep.mubr.msk.f32.mxu1 %vm3599_vm0, %v3600_v7 }
 0x192   : > { %3066 = vmatmul.mubr.f32.gmra.mrb[142].mxu1 %v986_v32  ;;  %v928_v32 = vadd.f32 %v4029_v40, %v4211_v22 }
 0x193   : > { %3068 = vmatprep.mubr.msk.f32.mxu1 %vm3599_vm0, %v3600_v7 }
 0x196   : > { %3069 = vmatmul.mubr.f32.gmra.mrb[144].mxu1 %v987_v38 }
 0x197   : > { %3071 = vmatprep.mubr.msk.f32.mxu1 %vm3599_vm0, %v3600_v7 }
 0x19a   : > { %3072 = vmatmul.mubr.f32.gmra.mrb[146].mxu1 %v988_v45  ;;  %v1005_v45 = vmax.f32 %v928_v32, 0.0 }
 0x19b   : > { %3074 = vmatprep.mubr.msk.f32.mxu1 %vm3599_vm0, %v3600_v7 }
 0x19e   : > { %3075 = vmatmul.mubr.f32.gmra.mrb[148].mxu1 %v989_v51 }
 0x19f   : > { %3077 = vmatprep.mubr.msk.f32.mxu1 %vm3599_vm0, %v3600_v7 }
 0x1a2   : > { %3078 = vmatmul.mubr.f32.gmra.mrb[150].mxu1 %v990_v62 }
 0x1a3   : > { %3080 = vmatprep.mubr.msk.f32.mxu1 %vm3599_vm0, %v3600_v7 }
 0x1a6   : > { %3081 = vmatmul.mubr.f32.gmra.mrb[152].mxu1 %v991_v6  ;;  %v938_v6 = vadd.f32 %v4029_v40, %v4221_v42 }
 0x1a7   : > { %3083 = vmatprep.mubr.msk.f32.mxu1 %vm3599_vm0, %v3600_v7 }
 0x1aa   : > { %3084 = vmatmul.mubr.f32.gmra.mrb[154].mxu1 %v992_v14 }
 0x1ab   : > { %3086 = vmatprep.mubr.msk.f32.mxu1 %vm3599_vm0, %v3600_v7 }
 0x1ae   : > { %3087 = vmatmul.mubr.f32.gmra.mrb[156].mxu1 %v993_v21  ;;  %v1007_v21 = vmax.f32 %v938_v6, 0.0 }
 0x1af   : > { %3089 = vmatprep.mubr.msk.f32.mxu1 %vm3599_vm0, %v3600_v7 }
 0x1b2   : > { %3090 = vmatmul.mubr.f32.gmra.mrb[158].mxu1 %v994_v31 }
 0x1b3   : > { %3092 = vmatprep.mubr.msk.f32.mxu1 %vm3599_vm0, %v3600_v7 }
 0x1b6   : > { %3093 = vmatmul.mubr.f32.gmra.mrb[160].mxu1 %v995_v39 }
 0x1b7   : > { %3095 = vmatprep.mubr.msk.f32.mxu1 %vm3599_vm0, %v3600_v7 }
 0x1ba   : > { %3096 = vmatmul.mubr.f32.gmra.mrb[162].mxu1 %v996_v47 }
 0x1bb   : > { %3098 = vmatprep.mubr.msk.f32.mxu1 %vm3599_vm0, %v3600_v7 }
 0x1be   : > { %3099 = vmatmul.mubr.f32.gmra.mrb[164].mxu1 %v997_v54 }
 0x1bf   : > { %3101 = vmatprep.mubr.msk.f32.mxu1 %vm3599_vm0, %v3600_v7 }
 0x1c2   : > { %3102 = vmatmul.mubr.f32.gmra.mrb[166].mxu1 %v998_v1 }
 0x1c3   : > { %3104 = vmatprep.mubr.msk.f32.mxu1 %vm3599_vm0, %v3600_v7 }
 0x1c5   : > { %v1098_v43 = vpop.f32.mrb[62].mxu1 }
 0x1c6   : > { %v1099_v44 = vadd.f32 %v4317_v12, %v1098_v43  ;;  %v2947_v48 = vpop.f32.mrb[63].mxu1  ;;  %3105 = vmatmul.mubr.f32.gmra.mrb[168].mxu1 %v999_v41 }
 0x1c7   : > { %3107 = vmatprep.mubr.msk.f32.mxu1 %vm3599_vm0, %v3600_v7 }
 0x1c8   : > { %v1412_v49 = vmax.f32 %v1099_v44, 0.0 }
 0x1c9   : > { %v1103_v50 = vpop.f32.mrb[64].mxu1 }
 0x1ca   : > { %v1104_v56 = vadd.f32 %v4317_v12, %v1103_v50  ;;  %v2950_v57 = vpop.f32.mrb[65].mxu1  ;;  %3108 = vmatmul.mubr.f32.gmra.mrb[170].mxu1 %v1000_v28  ;;  %3167 = vmatmul.mubr.f32.vlgmr.msra.gmra.mrb[64].mxu0 %v1412_v49 }
 0x1cb   : > { %3110 = vmatprep.mubr.msk.f32.mxu1 %vm3599_vm0, %v3600_v7  ;;  %3169 = vmatprep.mubr.msk.f32.mxu0 %vm3599_vm0, %v3600_v7 }
 0x1cc   : > { %v1413_v60 = vmax.f32 %v1104_v56, 0.0 }
 0x1cd   : > { %v1108_v52 = vpop.f32.mrb[66].mxu1 }
 0x1ce   : > { %v1109_v46 = vadd.f32 %v4317_v12, %v1108_v52  ;;  %v2953_v61 = vpop.f32.mrb[67].mxu1  ;;  %3111 = vmatmul.mubr.f32.gmra.mrb[172].mxu1 %v1001_v36  ;;  %3170 = vmatmul.mubr.f32.gmra.mrb[66].mxu0 %v1413_v60 }
 0x1cf   : > { %3113 = vmatprep.mubr.msk.f32.mxu1 %vm3599_vm0, %v3600_v7  ;;  %3172 = vmatprep.mubr.msk.f32.mxu0 %vm3599_vm0, %v3600_v7 }
 0x1d0   : > { %v1414_v2 = vmax.f32 %v1109_v46, 0.0 }
 0x1d1   : > { %v1113_v3 = vpop.f32.mrb[68].mxu1 }
 0x1d2   : > { %v1114_v55 = vadd.f32 %v4317_v12, %v1113_v3  ;;  %v2956_v5 = vpop.f32.mrb[69].mxu1  ;;  %3114 = vmatmul.mubr.f32.gmra.mrb[174].mxu1 %v1002_v0  ;;  %3173 = vmatmul.mubr.f32.gmra.mrb[68].mxu0 %v1414_v2 }
 0x1d3   : > { %3116 = vmatprep.mubr.msk.f32.mxu1 %vm3599_vm0, %v3600_v7  ;;  %3175 = vmatprep.mubr.msk.f32.mxu0 %vm3599_vm0, %v3600_v7 }
 0x1d4   : > { %v1415_v17 = vmax.f32 %v1114_v55, 0.0 }
 0x1d5   : > { %v1118_v9 = vpop.f32.mrb[70].mxu1 }
 0x1d6   : > { %v1119_v63 = vadd.f32 %v4317_v12, %v1118_v9  ;;  %v2959_v23 = vpop.f32.mrb[71].mxu1  ;;  %3117 = vmatmul.mubr.f32.gmra.mrb[176].mxu1 %v1003_v11  ;;  %3176 = vmatmul.mubr.f32.gmra.mrb[70].mxu0 %v1415_v17 }
 0x1d7   : > { %3119 = vmatprep.mubr.msk.f32.mxu1 %vm3599_vm0, %v3600_v7  ;;  %3178 = vmatprep.mubr.msk.f32.mxu0 %vm3599_vm0, %v3600_v7 }
 0x1d8   : > { %v1416_v15 = vmax.f32 %v1119_v63, 0.0 }
 0x1d9   : > { %v1123_v38 = vpop.f32.mrb[72].mxu1 }
 0x1da   : > { %v1124_v10 = vadd.f32 %v4317_v12, %v1123_v38  ;;  %v2962_v16 = vpop.f32.mrb[73].mxu1  ;;  %3120 = vmatmul.mubr.f32.gmra.mrb[178].mxu1 %v1004_v13  ;;  %3179 = vmatmul.mubr.f32.gmra.mrb[72].mxu0 %v1416_v15 }
 0x1db   : > { %3122 = vmatprep.mubr.msk.f32.mxu1 %vm3599_vm0, %v3600_v7  ;;  %3181 = vmatprep.mubr.msk.f32.mxu0 %vm3599_vm0, %v3600_v7 }
 0x1dc   : > { %v1417_v51 = vmax.f32 %v1124_v10, 0.0 }
 0x1dd   : > { %v1128_v19 = vpop.f32.mrb[74].mxu1 }
 0x1de   : > { %v1129_v22 = vadd.f32 %v4317_v12, %v1128_v19  ;;  %v2965_v62 = vpop.f32.mrb[75].mxu1  ;;  %3123 = vmatmul.mubr.f32.gmra.mrb[180].mxu1 %v1005_v45  ;;  %3182 = vmatmul.mubr.f32.gmra.mrb[74].mxu0 %v1417_v51 }
 0x1df   : > { %3125 = vmatprep.mubr.msk.f32.mxu1 %vm3599_vm0, %v3600_v7  ;;  %3184 = vmatprep.mubr.msk.f32.mxu0 %vm3599_vm0, %v3600_v7 }
 0x1e0   : > { %v1418_v25 = vmax.f32 %v1129_v22, 0.0 }
 0x1e1   : > { %v1133_v14 = vpop.f32.mrb[76].mxu1 }
 0x1e2   : > { %v1134_v30 = vadd.f32 %v4317_v12, %v1133_v14  ;;  %v2968_v26 = vpop.f32.mrb[77].mxu1  ;;  %3126 = vmatmul.mubr.f32.gmra.mrb[182].mxu1 %v1006_v24  ;;  %3185 = vmatmul.mubr.f32.gmra.mrb[76].mxu0 %v1418_v25 }
 0x1e3   : > { %3128 = vmatprep.mubr.msk.f32.mxu1 %vm3599_vm0, %v3600_v7  ;;  %3187 = vmatprep.mubr.msk.f32.mxu0 %vm3599_vm0, %v3600_v7 }
 0x1e4   : > { %v1419_v31 = vmax.f32 %v1134_v30, 0.0 }
 0x1e5   : > { %v1138_v29 = vpop.f32.mrb[78].mxu1 }
 0x1e6   : > { %v1139_v42 = vadd.f32 %v4317_v12, %v1138_v29  ;;  %v2971_v39 = vpop.f32.mrb[79].mxu1  ;;  %3129 = vmatmul.mubr.f32.gmra.mrb[184].mxu1 %v1007_v21  ;;  %3188 = vmatmul.mubr.f32.gmra.mrb[78].mxu0 %v1419_v31 }
 0x1e7   : > { %3131 = vmatprep.mubr.msk.f32.mxu1 %vm3599_vm0, %v3600_v7  ;;  %3190 = vmatprep.mubr.msk.f32.mxu0 %vm3599_vm0, %v3600_v7 }
 0x1e8   : > { %v1420_v47 = vmax.f32 %v1139_v42, 0.0 }
 0x1e9   : > { %v1143_v34 = vpop.f32.mrb[80].mxu1 }
 0x1ea   : > { %v1144_v54 = vadd.f32 %v4317_v12, %v1143_v34  ;;  %v2974_v35 = vpop.f32.mrb[81].mxu1  ;;  %3132 = vmatmul.mubr.f32.gmra.mrb[186].mxu1 %v1008_v33  ;;  %3191 = vmatmul.mubr.f32.gmra.mrb[80].mxu0 %v1420_v47 }
 0x1eb   : > { %3193 = vmatprep.mubr.msk.f32.mxu0 %vm3599_vm0, %v3600_v7 }
 0x1ec   : > { %v1421_v40 = vmax.f32 %v1144_v54, 0.0 }
 0x1ed   : > { %v1148_v53 = vpop.f32.mrb[82].mxu1 }
 0x1ee   : > { %v1149_v1 = vadd.f32 %v4317_v12, %v1148_v53  ;;  %v2977_v37 = vpop.f32.mrb[83].mxu1  ;;  %3194 = vmatmul.mubr.f32.gmra.mrb[82].mxu0 %v1421_v40 }
 0x1ef   : > { %3196 = vmatprep.mubr.msk.f32.mxu0 %vm3599_vm0, %v3600_v7 }
 0x1f0   : > { %v1422_v41 = vmax.f32 %v1149_v1, 0.0 }
 0x1f1   : > { %v1153_v20 = vpop.f32.mrb[84].mxu1 }
 0x1f2   : > { %v1154_v43 = vadd.f32 %v4317_v12, %v1153_v20  ;;  %v2980_v44 = vpop.f32.mrb[85].mxu1  ;;  %3197 = vmatmul.mubr.f32.gmra.mrb[84].mxu0 %v1422_v41 }
 0x1f3   : > { %3199 = vmatprep.mubr.msk.f32.mxu0 %vm3599_vm0, %v3600_v7 }
 0x1f4   : > { %v1423_v48 = vmax.f32 %v1154_v43, 0.0 }
 0x1f5   : > { %v1158_v28 = vpop.f32.mrb[86].mxu1 }
 0x1f6   : > { %v1159_v4 = vadd.f32 %v4317_v12, %v1158_v28  ;;  %v2983_v49 = vpop.f32.mrb[87].mxu1  ;;  %3200 = vmatmul.mubr.f32.gmra.mrb[86].mxu0 %v1423_v48 }
 0x1f7   : > { %3202 = vmatprep.mubr.msk.f32.mxu0 %vm3599_vm0, %v3600_v7 }
 0x1f8   : > { %v1424_v50 = vmax.f32 %v1159_v4, 0.0 }
 0x1f9   : > { %v1163_v56 = vpop.f32.mrb[88].mxu1 }
 0x1fa   : > { %v1164_v57 = vadd.f32 %v4317_v12, %v1163_v56  ;;  %v2986_v36 = vpop.f32.mrb[89].mxu1  ;;  %3203 = vmatmul.mubr.f32.gmra.mrb[88].mxu0 %v1424_v50 }
 0x1fb   : > { %3205 = vmatprep.mubr.msk.f32.mxu0 %vm3599_vm0, %v3600_v7 }
 0x1fc   : > { %v1425_v59 = vmax.f32 %v1164_v57, 0.0 }
 0x1fd   : > { %v1168_v60 = vpop.f32.mrb[90].mxu1 }
 0x1fe   : > { %v1169_v52 = vadd.f32 %v4317_v12, %v1168_v60  ;;  %v2989_v46 = vpop.f32.mrb[91].mxu1  ;;  %3206 = vmatmul.mubr.f32.gmra.mrb[90].mxu0 %v1425_v59 }
 0x1ff   : > { %3208 = vmatprep.mubr.msk.f32.mxu0 %vm3599_vm0, %v3600_v7 }
 0x200   : > { %v1426_v61 = vmax.f32 %v1169_v52, 0.0 }
 0x201   : > { %v1173_v0 = vpop.f32.mrb[92].mxu1 }
 0x202   : > { %v1174_v58 = vadd.f32 %v4317_v12, %v1173_v0  ;;  %v2992_v2 = vpop.f32.mrb[93].mxu1  ;;  %3209 = vmatmul.mubr.f32.gmra.mrb[92].mxu0 %v1426_v61 }
 0x203   : > { %3211 = vmatprep.mubr.msk.f32.mxu0 %vm3599_vm0, %v3600_v7 }
 0x204   : > { %v1427_v3 = vmax.f32 %v1174_v58, 0.0 }
 0x205   : > { %v1178_v55 = vpop.f32.mrb[94].mxu1 }
 0x206   : > { %v1179_v5 = vadd.f32 %v4317_v12, %v1178_v55  ;;  %v2995_v11 = vpop.f32.mrb[95].mxu1  ;;  %3212 = vmatmul.mubr.f32.gmra.mrb[94].mxu0 %v1427_v3 }
 0x207   : > { %3214 = vmatprep.mubr.msk.f32.mxu0 %vm3599_vm0, %v3600_v7 }
 0x208   : > { %v1428_v8 = vmax.f32 %v1179_v5, 0.0 }
 0x209   : > { %v1183_v17 = vpop.f32.mrb[96].mxu1 }
 0x20a   : > { %v1184_v9 = vadd.f32 %v4317_v12, %v1183_v17  ;;  %v2998_v63 = vpop.f32.mrb[97].mxu1  ;;  %3215 = vmatmul.mubr.f32.gmra.mrb[96].mxu0 %v1428_v8 }
 0x20b   : > { %3217 = vmatprep.mubr.msk.f32.mxu0 %vm3599_vm0, %v3600_v7 }
 0x20c   : > { %v1429_v23 = vmax.f32 %v1184_v9, 0.0 }
 0x20d   : > { %v1188_v13 = vpop.f32.mrb[98].mxu1 }
 0x20e   : > { %v1189_v32 = vadd.f32 %v4317_v12, %v1188_v13  ;;  %v3001_v15 = vpop.f32.mrb[99].mxu1  ;;  %3218 = vmatmul.mubr.f32.gmra.mrb[98].mxu0 %v1429_v23 }
 0x20f   : > { %3220 = vmatprep.mubr.msk.f32.mxu0 %vm3599_vm0, %v3600_v7 }
 0x210   : > { %v1430_v38 = vmax.f32 %v1189_v32, 0.0 }
 0x211   : > { %v1193_v10 = vpop.f32.mrb[100].mxu1 }
 0x212   : > { %v1194_v16 = vadd.f32 %v4317_v12, %v1193_v10  ;;  %v3004_v45 = vpop.f32.mrb[101].mxu1  ;;  %3221 = vmatmul.mubr.f32.gmra.mrb[100].mxu0 %v1430_v38 }
 0x213   : > { %3223 = vmatprep.mubr.msk.f32.mxu0 %vm3599_vm0, %v3600_v7 }
 0x214   : > { %v1431_v18 = vmax.f32 %v1194_v16, 0.0 }
 0x215   : > { %v1198_v51 = vpop.f32.mrb[102].mxu1 }
 0x216   : > { %v1199_v19 = vadd.f32 %v4317_v12, %v1198_v51  ;;  %v3007_v22 = vpop.f32.mrb[103].mxu1  ;;  %3224 = vmatmul.mubr.f32.gmra.mrb[102].mxu0 %v1431_v18 }
 0x217   : > { %3226 = vmatprep.mubr.msk.f32.mxu0 %vm3599_vm0, %v3600_v7 }
 0x218   : > { %v1432_v62 = vmax.f32 %v1199_v19, 0.0 }
 0x219   : > { %v1203_v24 = vpop.f32.mrb[104].mxu1 }
 0x21a   : > { %v1204_v6 = vadd.f32 %v4317_v12, %v1203_v24  ;;  %v3010_v25 = vpop.f32.mrb[105].mxu1  ;;  %3227 = vmatmul.mubr.f32.gmra.mrb[104].mxu0 %v1432_v62 }
 0x21b   : > { %3229 = vmatprep.mubr.msk.f32.mxu0 %vm3599_vm0, %v3600_v7 }
 0x21c   : > { %v1433_v14 = vmax.f32 %v1204_v6, 0.0 }
 0x21d   : > { %v1208_v30 = vpop.f32.mrb[106].mxu1 }
 0x21e   : > { %v1209_v26 = vadd.f32 %v4317_v12, %v1208_v30  ;;  %v3013_v21 = vpop.f32.mrb[107].mxu1  ;;  %3230 = vmatmul.mubr.f32.gmra.mrb[106].mxu0 %v1433_v14 }
 0x21f   : > { %3232 = vmatprep.mubr.msk.f32.mxu0 %vm3599_vm0, %v3600_v7 }
 0x220   : > { %v1434_v27 = vmax.f32 %v1209_v26, 0.0 }
 0x221   : > { %v1213_v31 = vpop.f32.mrb[108].mxu1 }
 0x222   : > { %v1214_v29 = vadd.f32 %v4317_v12, %v1213_v31  ;;  %v3016_v42 = vpop.f32.mrb[109].mxu1  ;;  %3233 = vmatmul.mubr.f32.gmra.mrb[108].mxu0 %v1434_v27 }
 0x223   : > { %3235 = vmatprep.mubr.msk.f32.mxu0 %vm3599_vm0, %v3600_v7 }
 0x224   : > { %v1435_v39 = vmax.f32 %v1214_v29, 0.0 }
 0x225   : > { %v1218_v33 = vpop.f32.mrb[110].mxu1 }
 0x226   : > { %v1219_v47 = vadd.f32 %v4317_v12, %v1218_v33  ;;  %v3019_v34 = vpop.f32.mrb[111].mxu1  ;;  %3236 = vmatmul.mubr.f32.gmra.mrb[110].mxu0 %v1435_v39 }
 0x227   : > { %3238 = vmatprep.mubr.msk.f32.mxu0 %vm3599_vm0, %v3600_v7 }
 0x228   : > { %v1436_v54 = vmax.f32 %v1219_v47, 0.0 }
 0x229   : > { %v1223_v35 = vpop.f32.mrb[112].mxu1 }
 0x22a   : > { %v1224_v40 = vadd.f32 %v4317_v12, %v1223_v35  ;;  %v3022_v53 = vpop.f32.mrb[113].mxu1  ;;  %3239 = vmatmul.mubr.f32.gmra.mrb[112].mxu0 %v1436_v54 }
 0x22b   : > { %3241 = vmatprep.mubr.msk.f32.mxu0 %vm3599_vm0, %v3600_v7 }
 0x22c   : > { %v1437_v1 = vmax.f32 %v1224_v40, 0.0 }
 0x22d   : > { %v1228_v37 = vpop.f32.mrb[114].mxu1 }
 0x22e   : > { %v1229_v41 = vadd.f32 %v4317_v12, %v1228_v37  ;;  %v3025_v20 = vpop.f32.mrb[115].mxu1  ;;  %3242 = vmatmul.mubr.f32.gmra.mrb[114].mxu0 %v1437_v1 }
 0x22f   : > { %3244 = vmatprep.mubr.msk.f32.mxu0 %vm3599_vm0, %v3600_v7 }
 0x230   : > { %v1438_v43 = vmax.f32 %v1229_v41, 0.0 }
 0x231   : > { %v1233_v44 = vpop.f32.mrb[116].mxu1 }
 0x232   : > { %v1234_v48 = vadd.f32 %v4317_v12, %v1233_v44  ;;  %v3028_v28 = vpop.f32.mrb[117].mxu1  ;;  %3245 = vmatmul.mubr.f32.gmra.mrb[116].mxu0 %v1438_v43 }
 0x233   : > { %3247 = vmatprep.mubr.msk.f32.mxu0 %vm3599_vm0, %v3600_v7 }
 0x234   : > { %v1439_v4 = vmax.f32 %v1234_v48, 0.0 }
 0x235   : > { %v1238_v49 = vpop.f32.mrb[118].mxu1 }
 0x236   : > { %v1239_v50 = vadd.f32 %v4317_v12, %v1238_v49  ;;  %v3031_v56 = vpop.f32.mrb[119].mxu1  ;;  %3248 = vmatmul.mubr.f32.gmra.mrb[118].mxu0 %v1439_v4 }
 0x237   : > { %3250 = vmatprep.mubr.msk.f32.mxu0 %vm3599_vm0, %v3600_v7 }
 0x238   : > { %v1440_v57 = vmax.f32 %v1239_v50, 0.0 }
 0x239   : > { %v1243_v36 = vpop.f32.mrb[120].mxu1 }
 0x23a   : > { %v1244_v59 = vadd.f32 %v4317_v12, %v1243_v36  ;;  %v3034_v60 = vpop.f32.mrb[121].mxu1  ;;  %3251 = vmatmul.mubr.f32.gmra.mrb[120].mxu0 %v1440_v57 }
 0x23b   : > { %3253 = vmatprep.mubr.msk.f32.mxu0 %vm3599_vm0, %v3600_v7 }
 0x23c   : > { %v1441_v52 = vmax.f32 %v1244_v59, 0.0 }
 0x23d   : > { %v1248_v46 = vpop.f32.mrb[122].mxu1 }
 0x23e   : > { %v1249_v61 = vadd.f32 %v4317_v12, %v1248_v46  ;;  %v3037_v0 = vpop.f32.mrb[123].mxu1  ;;  %3254 = vmatmul.mubr.f32.gmra.mrb[122].mxu0 %v1441_v52 }
 0x23f   : > { %3256 = vmatprep.mubr.msk.f32.mxu0 %vm3599_vm0, %v3600_v7 }
 0x240   : > { %v1442_v58 = vmax.f32 %v1249_v61, 0.0 }
 0x241   : > { %v1253_v2 = vpop.f32.mrb[124].mxu1 }
 0x242   : > { %v1254_v3 = vadd.f32 %v4317_v12, %v1253_v2  ;;  %v3040_v55 = vpop.f32.mrb[125].mxu1  ;;  %3257 = vmatmul.mubr.f32.gmra.mrb[124].mxu0 %v1442_v58 }
 0x243   : > { %3259 = vmatprep.mubr.msk.f32.mxu0 %vm3599_vm0, %v3600_v7 }
 0x244   : > { %v1443_v5 = vmax.f32 %v1254_v3, 0.0 }
 0x245   : > { %v1258_v11 = vpop.f32.mrb[126].mxu1 }
 0x246   : > { %v1259_v8 = vadd.f32 %v4317_v12, %v1258_v11  ;;  %v3043_v17 = vpop.f32.mrb[127].mxu1  ;;  %3260 = vmatmul.mubr.f32.gmra.mrb[126].mxu0 %v1443_v5 }
 0x247   : > { %3262 = vmatprep.mubr.msk.f32.mxu0 %vm3599_vm0, %v3600_v7 }
 0x248   : > { %v1444_v9 = vmax.f32 %v1259_v8, 0.0 }
 0x249   : > { %v1263_v63 = vpop.f32.mrb[128].mxu1 }
 0x24a   : > { %v1264_v23 = vadd.f32 %v4317_v12, %v1263_v63  ;;  %v3046_v13 = vpop.f32.mrb[129].mxu1  ;;  %3263 = vmatmul.mubr.f32.gmra.mrb[128].mxu0 %v1444_v9 }
 0x24b   : > { %3265 = vmatprep.mubr.msk.f32.mxu0 %vm3599_vm0, %v3600_v7 }
 0x24c   : > { %v1445_v32 = vmax.f32 %v1264_v23, 0.0 }
 0x24d   : > { %v1268_v15 = vpop.f32.mrb[130].mxu1 }
 0x24e   : > { %v1269_v38 = vadd.f32 %v4317_v12, %v1268_v15  ;;  %v3049_v10 = vpop.f32.mrb[131].mxu1  ;;  %3266 = vmatmul.mubr.f32.gmra.mrb[130].mxu0 %v1445_v32 }
 0x24f   : > { %3268 = vmatprep.mubr.msk.f32.mxu0 %vm3599_vm0, %v3600_v7 }
 0x250   : > { %v1446_v16 = vmax.f32 %v1269_v38, 0.0 }
 0x251   : > { %v1273_v45 = vpop.f32.mrb[132].mxu1 }
 0x252   : > { %v1274_v18 = vadd.f32 %v4317_v12, %v1273_v45  ;;  %v3052_v51 = vpop.f32.mrb[133].mxu1  ;;  %3269 = vmatmul.mubr.f32.gmra.mrb[132].mxu0 %v1446_v16 }
 0x253   : > { %3271 = vmatprep.mubr.msk.f32.mxu0 %vm3599_vm0, %v3600_v7 }
 0x254   : > { %v1447_v19 = vmax.f32 %v1274_v18, 0.0 }
 0x255   : > { %v1278_v22 = vpop.f32.mrb[134].mxu1 }
 0x256   : > { %v1279_v62 = vadd.f32 %v4317_v12, %v1278_v22  ;;  %v3055_v24 = vpop.f32.mrb[135].mxu1  ;;  %3272 = vmatmul.mubr.f32.gmra.mrb[134].mxu0 %v1447_v19 }
 0x257   : > { %3274 = vmatprep.mubr.msk.f32.mxu0 %vm3599_vm0, %v3600_v7 }
 0x258   : > { %v1448_v6 = vmax.f32 %v1279_v62, 0.0 }
 0x259   : > { %v1283_v25 = vpop.f32.mrb[136].mxu1 }
 0x25a   : > { %v1284_v14 = vadd.f32 %v4317_v12, %v1283_v25  ;;  %v3058_v30 = vpop.f32.mrb[137].mxu1  ;;  %3275 = vmatmul.mubr.f32.gmra.mrb[136].mxu0 %v1448_v6 }
 0x25b   : > { %3277 = vmatprep.mubr.msk.f32.mxu0 %vm3599_vm0, %v3600_v7 }
 0x25c   : > { %v1449_v26 = vmax.f32 %v1284_v14, 0.0 }
 0x25d   : > { %v1288_v21 = vpop.f32.mrb[138].mxu1 }
 0x25e   : > { %v1289_v27 = vadd.f32 %v4317_v12, %v1288_v21  ;;  %v3061_v31 = vpop.f32.mrb[139].mxu1  ;;  %3278 = vmatmul.mubr.f32.gmra.mrb[138].mxu0 %v1449_v26 }
 0x25f   : > { %3280 = vmatprep.mubr.msk.f32.mxu0 %vm3599_vm0, %v3600_v7 }
 0x260   : > { %v1450_v29 = vmax.f32 %v1289_v27, 0.0  ;;  %v4516_v27 = vld [vmem:[#allocation2] ss:$0 sm:$0xff] }
 0x261   : > { %v1293_v42 = vpop.f32.mrb[140].mxu1 }
 0x262   : > { %v1294_v39 = vadd.f32 %v4317_v12, %v1293_v42  ;;  %v3064_v33 = vpop.f32.mrb[141].mxu1  ;;  %3281 = vmatmul.mubr.f32.gmra.mrb[140].mxu0 %v1450_v29 }
 0x263   : > { %3283 = vmatprep.mubr.msk.f32.mxu0 %vm3599_vm0, %v3600_v7 }
 0x264   : > { %v1451_v47 = vmax.f32 %v1294_v39, 0.0 }
 0x265   : > { %v1298_v34 = vpop.f32.mrb[142].mxu1 }
 0x266   : > { %v1299_v54 = vadd.f32 %v4317_v12, %v1298_v34  ;;  %v3067_v35 = vpop.f32.mrb[143].mxu1  ;;  %3284 = vmatmul.mubr.f32.gmra.mrb[142].mxu0 %v1451_v47 }
 0x267   : > { %3286 = vmatprep.mubr.msk.f32.mxu0 %vm3599_vm0, %v3600_v7 }
 0x268   : > { %v1452_v40 = vmax.f32 %v1299_v54, 0.0 }
 0x269   : > { %v1303_v53 = vpop.f32.mrb[144].mxu1 }
 0x26a   : > { %v1304_v1 = vadd.f32 %v4317_v12, %v1303_v53  ;;  %v3070_v37 = vpop.f32.mrb[145].mxu1  ;;  %3287 = vmatmul.mubr.f32.gmra.mrb[144].mxu0 %v1452_v40 }
 0x26b   : > { %3289 = vmatprep.mubr.msk.f32.mxu0 %vm3599_vm0, %v3600_v7 }
 0x26c   : > { %v1453_v41 = vmax.f32 %v1304_v1, 0.0 }
 0x26d   : > { %v1308_v20 = vpop.f32.mrb[146].mxu1 }
 0x26e   : > { %v1309_v43 = vadd.f32 %v4317_v12, %v1308_v20  ;;  %v3073_v44 = vpop.f32.mrb[147].mxu1  ;;  %3290 = vmatmul.mubr.f32.gmra.mrb[146].mxu0 %v1453_v41 }
 0x26f   : > { %3292 = vmatprep.mubr.msk.f32.mxu0 %vm3599_vm0, %v3600_v7 }
 0x270   : > { %v1454_v48 = vmax.f32 %v1309_v43, 0.0 }
 0x271   : > { %v1313_v28 = vpop.f32.mrb[148].mxu1 }
 0x272   : > { %v1314_v4 = vadd.f32 %v4317_v12, %v1313_v28  ;;  %v3076_v49 = vpop.f32.mrb[149].mxu1  ;;  %3293 = vmatmul.mubr.f32.gmra.mrb[148].mxu0 %v1454_v48 }
 0x273   : > { %3295 = vmatprep.mubr.msk.f32.mxu0 %vm3599_vm0, %v3600_v7 }
 0x274   : > { %v1455_v50 = vmax.f32 %v1314_v4, 0.0 }
 0x275   : > { %v1318_v56 = vpop.f32.mrb[150].mxu1 }
 0x276   : > { %v1319_v57 = vadd.f32 %v4317_v12, %v1318_v56  ;;  %v3079_v36 = vpop.f32.mrb[151].mxu1  ;;  %3296 = vmatmul.mubr.f32.gmra.mrb[150].mxu0 %v1455_v50 }
 0x277   : > { %3298 = vmatprep.mubr.msk.f32.mxu0 %vm3599_vm0, %v3600_v7 }
 0x278   : > { %v1456_v59 = vmax.f32 %v1319_v57, 0.0 }
 0x279   : > { %v1323_v60 = vpop.f32.mrb[152].mxu1 }
 0x27a   : > { %v1324_v52 = vadd.f32 %v4317_v12, %v1323_v60  ;;  %v3082_v46 = vpop.f32.mrb[153].mxu1  ;;  %3299 = vmatmul.mubr.f32.gmra.mrb[152].mxu0 %v1456_v59 }
 0x27b   : > { %3301 = vmatprep.mubr.msk.f32.mxu0 %vm3599_vm0, %v3600_v7 }
 0x27c   : > { %v1457_v61 = vmax.f32 %v1324_v52, 0.0 }
 0x27d   : > { %v1328_v0 = vpop.f32.mrb[154].mxu1 }
 0x27e   : > { %v1329_v58 = vadd.f32 %v4317_v12, %v1328_v0  ;;  %v3085_v2 = vpop.f32.mrb[155].mxu1  ;;  %3302 = vmatmul.mubr.f32.gmra.mrb[154].mxu0 %v1457_v61 }
 0x27f   : > { %3304 = vmatprep.mubr.msk.f32.mxu0 %vm3599_vm0, %v3600_v7 }
 0x280   : > { %v1458_v3 = vmax.f32 %v1329_v58, 0.0 }
 0x281   : > { %v1333_v55 = vpop.f32.mrb[156].mxu1 }
 0x282   : > { %v1334_v5 = vadd.f32 %v4317_v12, %v1333_v55  ;;  %v3088_v11 = vpop.f32.mrb[157].mxu1  ;;  %3305 = vmatmul.mubr.f32.gmra.mrb[156].mxu0 %v1458_v3 }
 0x283   : > { %3307 = vmatprep.mubr.msk.f32.mxu0 %vm3599_vm0, %v3600_v7 }
 0x284   : > { %v1459_v8 = vmax.f32 %v1334_v5, 0.0 }
 0x285   : > { %v1338_v17 = vpop.f32.mrb[158].mxu1 }
 0x286   : > { %v1339_v9 = vadd.f32 %v4317_v12, %v1338_v17  ;;  %v3091_v63 = vpop.f32.mrb[159].mxu1  ;;  %3308 = vmatmul.mubr.f32.gmra.mrb[158].mxu0 %v1459_v8 }
 0x287   : > { %3310 = vmatprep.mubr.msk.f32.mxu0 %vm3599_vm0, %v3600_v7 }
 0x288   : > { %v1460_v23 = vmax.f32 %v1339_v9, 0.0 }
 0x289   : > { %v1343_v13 = vpop.f32.mrb[160].mxu1 }
 0x28a   : > { %v1344_v32 = vadd.f32 %v4317_v12, %v1343_v13  ;;  %v3094_v15 = vpop.f32.mrb[161].mxu1  ;;  %3311 = vmatmul.mubr.f32.gmra.mrb[160].mxu0 %v1460_v23 }
 0x28b   : > { %3313 = vmatprep.mubr.msk.f32.mxu0 %vm3599_vm0, %v3600_v7 }
 0x28c   : > { %v1461_v38 = vmax.f32 %v1344_v32, 0.0 }
 0x28d   : > { %v1348_v10 = vpop.f32.mrb[162].mxu1 }
 0x28e   : > { %v1349_v16 = vadd.f32 %v4317_v12, %v1348_v10  ;;  %v3097_v45 = vpop.f32.mrb[163].mxu1  ;;  %3314 = vmatmul.mubr.f32.gmra.mrb[162].mxu0 %v1461_v38 }
 0x28f   : > { %3316 = vmatprep.mubr.msk.f32.mxu0 %vm3599_vm0, %v3600_v7 }
 0x290   : > { %v1462_v18 = vmax.f32 %v1349_v16, 0.0 }
 0x291   : > { %v1353_v51 = vpop.f32.mrb[164].mxu1 }
 0x292   : > { %v1354_v19 = vadd.f32 %v4317_v12, %v1353_v51  ;;  %v3100_v22 = vpop.f32.mrb[165].mxu1  ;;  %3317 = vmatmul.mubr.f32.gmra.mrb[164].mxu0 %v1462_v18 }
 0x293   : > { %3319 = vmatprep.mubr.msk.f32.mxu0 %vm3599_vm0, %v3600_v7 }
 0x294   : > { %v1463_v62 = vmax.f32 %v1354_v19, 0.0 }
 0x295   : > { %v1358_v24 = vpop.f32.mrb[166].mxu1 }
 0x296   : > { %v1359_v6 = vadd.f32 %v4317_v12, %v1358_v24  ;;  %v3103_v25 = vpop.f32.mrb[167].mxu1  ;;  %3320 = vmatmul.mubr.f32.gmra.mrb[166].mxu0 %v1463_v62 }
 0x297   : > { %3322 = vmatprep.mubr.msk.f32.mxu0 %vm3599_vm0, %v3600_v7 }
 0x298   : > { %v1464_v14 = vmax.f32 %v1359_v6, 0.0 }
 0x299   : > { %v1363_v30 = vpop.f32.mrb[168].mxu1 }
 0x29a   : > { %v1364_v26 = vadd.f32 %v4317_v12, %v1363_v30  ;;  %v3106_v21 = vpop.f32.mrb[169].mxu1  ;;  %3323 = vmatmul.mubr.f32.gmra.mrb[168].mxu0 %v1464_v14 }
 0x29b   : > { %3325 = vmatprep.mubr.msk.f32.mxu0 %vm3599_vm0, %v3600_v7 }
 0x29c   : > { %v1465_v31 = vmax.f32 %v1364_v26, 0.0 }
 0x29d   : > { %v1368_v29 = vpop.f32.mrb[170].mxu1  ;;  %v1564_v42 = vpop.f32.mrb[64].mxu0 }
 0x29e   : > { %v1369_v39 = vadd.f32 %v4317_v12, %v1368_v29  ;;  %v1565_v33 = vadd.f32 %v4516_v27, %v1564_v42  ;;  %v3109_v47 = vpop.f32.mrb[171].mxu1  ;;  %v3168_v34 = vpop.f32.mrb[65].mxu0  ;;  %3326 = vmatmul.mubr.f32.gmra.mrb[170].mxu0 %v1465_v31 }
 0x29f   : > { %3328 = vmatprep.mubr.msk.f32.mxu0 %vm3599_vm0, %v3600_v7 }
 0x2a0   : > { %v1466_v54 = vmax.f32 %v1369_v39, 0.0  ;;  %1879 = vst.msk [vmem:[%s4524_s26] sm:$0xff] %vm1878_vm2, %v1565_v33 }
 0x2a1   : > { %v1373_v35 = vpop.f32.mrb[172].mxu1  ;;  %v1569_v40 = vpop.f32.mrb[66].mxu0 }
 0x2a2   : > { %v1374_v53 = vadd.f32 %v4317_v12, %v1373_v35  ;;  %v1570_v1 = vadd.f32 %v4516_v27, %v1569_v40  ;;  %v3112_v37 = vpop.f32.mrb[173].mxu1  ;;  %v3171_v41 = vpop.f32.mrb[67].mxu0  ;;  %3329 = vmatmul.mubr.f32.gmra.mrb[172].mxu0 %v1466_v54 }
 0x2a3   : > { %3331 = vmatprep.mubr.msk.f32.mxu0 %vm3599_vm0, %v3600_v7 }
 0x2a4   : > { %v1467_v20 = vmax.f32 %v1374_v53, 0.0  ;;  %1880 = vst.msk [vmem:[%s4524_s26 + $0x8] sm:$0xff] %vm1878_vm2, %v1570_v1 }
 0x2a5   : > { %v1378_v43 = vpop.f32.mrb[174].mxu1  ;;  %v1574_v44 = vpop.f32.mrb[68].mxu0 }
 0x2a6   : > { %v1379_v48 = vadd.f32 %v4317_v12, %v1378_v43  ;;  %v1575_v28 = vadd.f32 %v4516_v27, %v1574_v44  ;;  %v3115_v4 = vpop.f32.mrb[175].mxu1  ;;  %v3174_v49 = vpop.f32.mrb[69].mxu0  ;;  %3332 = vmatmul.mubr.f32.gmra.mrb[174].mxu0 %v1467_v20 }
 0x2a7   : > { %3334 = vmatprep.mubr.msk.f32.mxu0 %vm3599_vm0, %v3600_v7 }
 0x2a8   : > { %v1468_v50 = vmax.f32 %v1379_v48, 0.0  ;;  %1881 = vst.msk [vmem:[%s4524_s26 + $0x10] sm:$0xff] %vm1878_vm2, %v1575_v28 }
 0x2a9   : > { %v1383_v56 = vpop.f32.mrb[176].mxu1  ;;  %v1579_v57 = vpop.f32.mrb[70].mxu0 }
 0x2aa   : > { %v1384_v36 = vadd.f32 %v4317_v12, %v1383_v56  ;;  %v1580_v59 = vadd.f32 %v4516_v27, %v1579_v57  ;;  %v3118_v60 = vpop.f32.mrb[177].mxu1  ;;  %v3177_v52 = vpop.f32.mrb[71].mxu0  ;;  %3335 = vmatmul.mubr.f32.gmra.mrb[176].mxu0 %v1468_v50 }
 0x2ab   : > { %3337 = vmatprep.mubr.msk.f32.mxu0 %vm3599_vm0, %v3600_v7 }
 0x2ac   : > { %v1469_v46 = vmax.f32 %v1384_v36, 0.0  ;;  %1882 = vst.msk [vmem:[%s4524_s26 + $0x18] sm:$0xff] %vm1878_vm2, %v1580_v59 }
 0x2ad   : > { %v1388_v61 = vpop.f32.mrb[178].mxu1  ;;  %v1584_v0 = vpop.f32.mrb[72].mxu0 }
 0x2ae   : > { %v1389_v58 = vadd.f32 %v4317_v12, %v1388_v61  ;;  %v1585_v2 = vadd.f32 %v4516_v27, %v1584_v0  ;;  %v3121_v3 = vpop.f32.mrb[179].mxu1  ;;  %v3180_v55 = vpop.f32.mrb[73].mxu0  ;;  %3338 = vmatmul.mubr.f32.gmra.mrb[178].mxu0 %v1469_v46 }
 0x2af   : > { %3340 = vmatprep.mubr.msk.f32.mxu0 %vm3599_vm0, %v3600_v7 }
 0x2b0   : > { %v1470_v5 = vmax.f32 %v1389_v58, 0.0  ;;  %1883 = vst.msk [vmem:[%s4524_s26 + $0x20] sm:$0xff] %vm1878_vm2, %v1585_v2 }
 0x2b1   : > { %v1393_v11 = vpop.f32.mrb[180].mxu1  ;;  %v1589_v8 = vpop.f32.mrb[74].mxu0 }
 0x2b2   : > { %v1394_v17 = vadd.f32 %v4317_v12, %v1393_v11  ;;  %v1590_v9 = vadd.f32 %v4516_v27, %v1589_v8  ;;  %v3124_v63 = vpop.f32.mrb[181].mxu1  ;;  %v3183_v23 = vpop.f32.mrb[75].mxu0  ;;  %3341 = vmatmul.mubr.f32.gmra.mrb[180].mxu0 %v1470_v5 }
 0x2b3   : > { %3343 = vmatprep.mubr.msk.f32.mxu0 %vm3599_vm0, %v3600_v7 }
 0x2b4   : > { %v1471_v13 = vmax.f32 %v1394_v17, 0.0  ;;  %1884 = vst.msk [vmem:[%s4524_s26 + $0x28] sm:$0xff] %vm1878_vm2, %v1590_v9 }
 0x2b5   : > { %v1398_v32 = vpop.f32.mrb[182].mxu1  ;;  %v1594_v15 = vpop.f32.mrb[76].mxu0 }
 0x2b6   : > { %v1399_v38 = vadd.f32 %v4317_v12, %v1398_v32  ;;  %v1595_v10 = vadd.f32 %v4516_v27, %v1594_v15  ;;  %v3127_v16 = vpop.f32.mrb[183].mxu1  ;;  %v3186_v45 = vpop.f32.mrb[77].mxu0  ;;  %3344 = vmatmul.mubr.f32.gmra.mrb[182].mxu0 %v1471_v13 }
 0x2b7   : > { %3346 = vmatprep.mubr.msk.f32.mxu0 %vm3599_vm0, %v3600_v7 }
 0x2b8   : > { %v1472_v18 = vmax.f32 %v1399_v38, 0.0  ;;  %1885 = vst.msk [vmem:[%s4524_s26 + $0x30] sm:$0xff] %vm1878_vm2, %v1595_v10 }
 0x2b9   : > { %v1403_v51 = vpop.f32.mrb[184].mxu1  ;;  %v1599_v19 = vpop.f32.mrb[78].mxu0 }
 0x2ba   : > { %v1404_v22 = vadd.f32 %v4317_v12, %v1403_v51  ;;  %v1600_v62 = vadd.f32 %v4516_v27, %v1599_v19  ;;  %v3130_v24 = vpop.f32.mrb[185].mxu1  ;;  %v3189_v6 = vpop.f32.mrb[79].mxu0  ;;  %3347 = vmatmul.mubr.f32.gmra.mrb[184].mxu0 %v1472_v18 }
 0x2bb   : > { %3349 = vmatprep.mubr.msk.f32.mxu0 %vm3599_vm0, %v3600_v7 }
 0x2bc   : > { %v1473_v25 = vmax.f32 %v1404_v22, 0.0  ;;  %1886 = vst.msk [vmem:[%s4524_s26 + $0x38] sm:$0xff] %vm1878_vm2, %v1600_v62 }
 0x2bd   : > { %v1408_v14 = vpop.f32.mrb[186].mxu1  ;;  %v1604_v30 = vpop.f32.mrb[80].mxu0 }
 0x2be   : > { %v1409_v26 = vadd.f32 %v4317_v12, %v1408_v14  ;;  %v1605_v21 = vadd.f32 %v4516_v27, %v1604_v30  ;;  %v3133_v31 = vpop.f32.mrb[187].mxu1  ;;  %v3192_v29 = vpop.f32.mrb[81].mxu0  ;;  %3350 = vmatmul.mubr.f32.gmra.mrb[186].mxu0 %v1473_v25 }
 0x2bf   : > { %3352 = vmatprep.mubr.msk.f32.mxu0 %vm3599_vm0, %v3600_v7 }
 0x2c0   : > { %v1474_v42 = vmax.f32 %v1409_v26, 0.0  ;;  %1887 = vst.msk [vmem:[%s4524_s26 + $0x40] sm:$0xff] %vm1878_vm2, %v1605_v21 }
 0x2c1   : > { %v1609_v39 = vpop.f32.mrb[82].mxu0 }
 0x2c2   : > { %v1610_v33 = vadd.f32 %v4516_v27, %v1609_v39  ;;  %v3195_v47 = vpop.f32.mrb[83].mxu0  ;;  %3353 = vmatmul.mubr.f32.gmra.mrb[188].mxu0 %v1474_v42 }
 0x2c4   : > { %1888 = vst.msk [vmem:[%s4524_s26 + $0x48] sm:$0xff] %vm1878_vm2, %v1610_v33 }
 0x2c5   : > { %v1614_v12 = vpop.f32.mrb[84].mxu0 }
 0x2c6   : > { %v1615_v34 = vadd.f32 %v4516_v27, %v1614_v12  ;;  %v3198_v54 = vpop.f32.mrb[85].mxu0 }
 0x2c8   : > { %1889 = vst.msk [vmem:[%s4524_s26 + $0x50] sm:$0xff] %vm1878_vm2, %v1615_v34 }
 0x2c9   : > { %v1619_v7 = vpop.f32.mrb[86].mxu0 }
 0x2ca   : > { %v1620_v35 = vadd.f32 %v4516_v27, %v1619_v7  ;;  %v3201_v40 = vpop.f32.mrb[87].mxu0 }
 0x2cc   : > { %1890 = vst.msk [vmem:[%s4524_s26 + $0x58] sm:$0xff] %vm1878_vm2, %v1620_v35 }
 0x2cd   : > { %v1624_v53 = vpop.f32.mrb[88].mxu0 }
 0x2ce   : > { %v1625_v1 = vadd.f32 %v4516_v27, %v1624_v53  ;;  %v3204_v37 = vpop.f32.mrb[89].mxu0 }
 0x2d0   : > { %1891 = vst.msk [vmem:[%s4524_s26 + $0x60] sm:$0xff] %vm1878_vm2, %v1625_v1 }
 0x2d1   : > { %v1629_v41 = vpop.f32.mrb[90].mxu0 }
 0x2d2   : > { %v1630_v20 = vadd.f32 %v4516_v27, %v1629_v41  ;;  %v3207_v43 = vpop.f32.mrb[91].mxu0 }
 0x2d4   : > { %1892 = vst.msk [vmem:[%s4524_s26 + $0x68] sm:$0xff] %vm1878_vm2, %v1630_v20 }
 0x2d5   : > { %v1634_v44 = vpop.f32.mrb[92].mxu0 }
 0x2d6   : > { %v1635_v48 = vadd.f32 %v4516_v27, %v1634_v44  ;;  %v3210_v28 = vpop.f32.mrb[93].mxu0 }
 0x2d8   : > { %1893 = vst.msk [vmem:[%s4524_s26 + $0x70] sm:$0xff] %vm1878_vm2, %v1635_v48 }
 0x2d9   : > { %v1639_v4 = vpop.f32.mrb[94].mxu0 }
 0x2da   : > { %v1640_v49 = vadd.f32 %v4516_v27, %v1639_v4  ;;  %v3213_v50 = vpop.f32.mrb[95].mxu0 }
 0x2dc   : > { %1894 = vst.msk [vmem:[%s4524_s26 + $0x78] sm:$0xff] %vm1878_vm2, %v1640_v49 }
 0x2dd   : > { %v1644_v56 = vpop.f32.mrb[96].mxu0 }
 0x2de   : > { %v1645_v57 = vadd.f32 %v4516_v27, %v1644_v56  ;;  %v3216_v36 = vpop.f32.mrb[97].mxu0 }
 0x2e0   : > { %1895 = vst.msk [vmem:[%s4524_s26 + $0x80] sm:$0xff] %vm1878_vm2, %v1645_v57 }
 0x2e1   : > { %v1649_v59 = vpop.f32.mrb[98].mxu0 }
 0x2e2   : > { %v1650_v60 = vadd.f32 %v4516_v27, %v1649_v59  ;;  %v3219_v52 = vpop.f32.mrb[99].mxu0 }
 0x2e4   : > { %1896 = vst.msk [vmem:[%s4524_s26 + $0x88] sm:$0xff] %vm1878_vm2, %v1650_v60 }
 0x2e5   : > { %v1654_v46 = vpop.f32.mrb[100].mxu0 }
 0x2e6   : > { %v1655_v61 = vadd.f32 %v4516_v27, %v1654_v46  ;;  %v3222_v0 = vpop.f32.mrb[101].mxu0 }
 0x2e8   : > { %1897 = vst.msk [vmem:[%s4524_s26 + $0x90] sm:$0xff] %vm1878_vm2, %v1655_v61 }
 0x2e9   : > { %v1659_v58 = vpop.f32.mrb[102].mxu0 }
 0x2ea   : > { %v1660_v2 = vadd.f32 %v4516_v27, %v1659_v58  ;;  %v3225_v3 = vpop.f32.mrb[103].mxu0 }
 0x2ec   : > { %1898 = vst.msk [vmem:[%s4524_s26 + $0x98] sm:$0xff] %vm1878_vm2, %v1660_v2 }
 0x2ed   : > { %v1664_v55 = vpop.f32.mrb[104].mxu0 }
 0x2ee   : > { %v1665_v5 = vadd.f32 %v4516_v27, %v1664_v55  ;;  %v3228_v11 = vpop.f32.mrb[105].mxu0 }
 0x2f0   : > { %1899 = vst.msk [vmem:[%s4524_s26 + $0xa0] sm:$0xff] %vm1878_vm2, %v1665_v5 }
 0x2f1   : > { %v1669_v8 = vpop.f32.mrb[106].mxu0 }
 0x2f2   : > { %v1670_v17 = vadd.f32 %v4516_v27, %v1669_v8  ;;  %v3231_v9 = vpop.f32.mrb[107].mxu0 }
 0x2f4   : > { %1900 = vst.msk [vmem:[%s4524_s26 + $0xa8] sm:$0xff] %vm1878_vm2, %v1670_v17 }
 0x2f5   : > { %v1674_v63 = vpop.f32.mrb[108].mxu0 }
 0x2f6   : > { %v1675_v23 = vadd.f32 %v4516_v27, %v1674_v63  ;;  %v3234_v13 = vpop.f32.mrb[109].mxu0 }
 0x2f8   : > { %1901 = vst.msk [vmem:[%s4524_s26 + $0xb0] sm:$0xff] %vm1878_vm2, %v1675_v23 }
 0x2f9   : > { %v1679_v32 = vpop.f32.mrb[110].mxu0 }
 0x2fa   : > { %v1680_v15 = vadd.f32 %v4516_v27, %v1679_v32  ;;  %v3237_v38 = vpop.f32.mrb[111].mxu0 }
 0x2fc   : > { %1902 = vst.msk [vmem:[%s4524_s26 + $0xb8] sm:$0xff] %vm1878_vm2, %v1680_v15 }
 0x2fd   : > { %v1684_v10 = vpop.f32.mrb[112].mxu0 }
 0x2fe   : > { %v1685_v16 = vadd.f32 %v4516_v27, %v1684_v10  ;;  %v3240_v45 = vpop.f32.mrb[113].mxu0 }
 0x300   : > { %1903 = vst.msk [vmem:[%s4524_s26 + $0xc0] sm:$0xff] %vm1878_vm2, %v1685_v16 }
 0x301   : > { %v1689_v18 = vpop.f32.mrb[114].mxu0 }
 0x302   : > { %v1690_v51 = vadd.f32 %v4516_v27, %v1689_v18  ;;  %v3243_v19 = vpop.f32.mrb[115].mxu0 }
 0x304   : > { %1904 = vst.msk [vmem:[%s4524_s26 + $0xc8] sm:$0xff] %vm1878_vm2, %v1690_v51 }
 0x305   : > { %v1694_v22 = vpop.f32.mrb[116].mxu0 }
 0x306   : > { %v1695_v62 = vadd.f32 %v4516_v27, %v1694_v22  ;;  %v3246_v24 = vpop.f32.mrb[117].mxu0 }
 0x308   : > { %1905 = vst.msk [vmem:[%s4524_s26 + $0xd0] sm:$0xff] %vm1878_vm2, %v1695_v62 }
 0x309   : > { %v1699_v6 = vpop.f32.mrb[118].mxu0 }
 0x30a   : > { %v1700_v25 = vadd.f32 %v4516_v27, %v1699_v6  ;;  %v3249_v14 = vpop.f32.mrb[119].mxu0 }
 0x30c   : > { %1906 = vst.msk [vmem:[%s4524_s26 + $0xd8] sm:$0xff] %vm1878_vm2, %v1700_v25 }
 0x30d   : > { %v1704_v30 = vpop.f32.mrb[120].mxu0 }
 0x30e   : > { %v1705_v26 = vadd.f32 %v4516_v27, %v1704_v30  ;;  %v3252_v21 = vpop.f32.mrb[121].mxu0 }
 0x310   : > { %1907 = vst.msk [vmem:[%s4524_s26 + $0xe0] sm:$0xff] %vm1878_vm2, %v1705_v26 }
 0x311   : > { %v1709_v31 = vpop.f32.mrb[122].mxu0 }
 0x312   : > { %v1710_v29 = vadd.f32 %v4516_v27, %v1709_v31  ;;  %v3255_v42 = vpop.f32.mrb[123].mxu0 }
 0x314   : > { %1908 = vst.msk [vmem:[%s4524_s26 + $0xe8] sm:$0xff] %vm1878_vm2, %v1710_v29 }
 0x315   : > { %v1714_v39 = vpop.f32.mrb[124].mxu0 }
 0x316   : > { %v1715_v33 = vadd.f32 %v4516_v27, %v1714_v39  ;;  %v3258_v47 = vpop.f32.mrb[125].mxu0 }
 0x318   : > { %1909 = vst.msk [vmem:[%s4524_s26 + $0xf0] sm:$0xff] %vm1878_vm2, %v1715_v33 }
 0x319   : > { %v1719_v12 = vpop.f32.mrb[126].mxu0 }
 0x31a   : > { %v1720_v34 = vadd.f32 %v4516_v27, %v1719_v12  ;;  %v3261_v54 = vpop.f32.mrb[127].mxu0 }
 0x31c   : > { %1910 = vst.msk [vmem:[%s4524_s26 + $0xf8] sm:$0xff] %vm1878_vm2, %v1720_v34 }
 0x31d   : > { %v1724_v7 = vpop.f32.mrb[128].mxu0 }
 0x31e   : > { %v1725_v35 = vadd.f32 %v4516_v27, %v1724_v7  ;;  %v3264_v40 = vpop.f32.mrb[129].mxu0 }
 0x320   : > { %1911 = vst.msk [vmem:[%s4524_s26 + $0x100] sm:$0xff] %vm1878_vm2, %v1725_v35 }
 0x321   : > { %v1729_v53 = vpop.f32.mrb[130].mxu0 }
 0x322   : > { %v1730_v1 = vadd.f32 %v4516_v27, %v1729_v53  ;;  %v3267_v37 = vpop.f32.mrb[131].mxu0 }
 0x324   : > { %1912 = vst.msk [vmem:[%s4524_s26 + $0x108] sm:$0xff] %vm1878_vm2, %v1730_v1 }
 0x325   : > { %v1734_v41 = vpop.f32.mrb[132].mxu0 }
 0x326   : > { %v1735_v20 = vadd.f32 %v4516_v27, %v1734_v41  ;;  %v3270_v43 = vpop.f32.mrb[133].mxu0 }
 0x328   : > { %1913 = vst.msk [vmem:[%s4524_s26 + $0x110] sm:$0xff] %vm1878_vm2, %v1735_v20 }
 0x329   : > { %v1739_v44 = vpop.f32.mrb[134].mxu0 }
 0x32a   : > { %v1740_v48 = vadd.f32 %v4516_v27, %v1739_v44  ;;  %v3273_v28 = vpop.f32.mrb[135].mxu0 }
 0x32c   : > { %1914 = vst.msk [vmem:[%s4524_s26 + $0x118] sm:$0xff] %vm1878_vm2, %v1740_v48 }
 0x32d   : > { %v1744_v4 = vpop.f32.mrb[136].mxu0 }
 0x32e   : > { %v1745_v49 = vadd.f32 %v4516_v27, %v1744_v4  ;;  %v3276_v50 = vpop.f32.mrb[137].mxu0 }
 0x330   : > { %1915 = vst.msk [vmem:[%s4524_s26 + $0x120] sm:$0xff] %vm1878_vm2, %v1745_v49 }
 0x331   : > { %v1749_v56 = vpop.f32.mrb[138].mxu0 }
 0x332   : > { %v1750_v57 = vadd.f32 %v4516_v27, %v1749_v56  ;;  %v3279_v36 = vpop.f32.mrb[139].mxu0 }
 0x334   : > { %1916 = vst.msk [vmem:[%s4524_s26 + $0x128] sm:$0xff] %vm1878_vm2, %v1750_v57 }
 0x335   : > { %v1754_v59 = vpop.f32.mrb[140].mxu0 }
 0x336   : > { %v1755_v60 = vadd.f32 %v4516_v27, %v1754_v59  ;;  %v3282_v52 = vpop.f32.mrb[141].mxu0 }
 0x338   : > { %1917 = vst.msk [vmem:[%s4524_s26 + $0x130] sm:$0xff] %vm1878_vm2, %v1755_v60 }
 0x339   : > { %v1759_v46 = vpop.f32.mrb[142].mxu0 }
 0x33a   : > { %v1760_v61 = vadd.f32 %v4516_v27, %v1759_v46  ;;  %v3285_v0 = vpop.f32.mrb[143].mxu0 }
 0x33c   : > { %1918 = vst.msk [vmem:[%s4524_s26 + $0x138] sm:$0xff] %vm1878_vm2, %v1760_v61 }
 0x33d   : > { %v1764_v58 = vpop.f32.mrb[144].mxu0 }
 0x33e   : > { %v1765_v2 = vadd.f32 %v4516_v27, %v1764_v58  ;;  %v3288_v3 = vpop.f32.mrb[145].mxu0 }
 0x340   : > { %1919 = vst.msk [vmem:[%s4524_s26 + $0x140] sm:$0xff] %vm1878_vm2, %v1765_v2 }
 0x341   : > { %v1769_v55 = vpop.f32.mrb[146].mxu0 }
 0x342   : > { %v1770_v5 = vadd.f32 %v4516_v27, %v1769_v55  ;;  %v3291_v11 = vpop.f32.mrb[147].mxu0 }
 0x344   : > { %1920 = vst.msk [vmem:[%s4524_s26 + $0x148] sm:$0xff] %vm1878_vm2, %v1770_v5 }
 0x345   : > { %v1774_v8 = vpop.f32.mrb[148].mxu0 }
 0x346   : > { %v1775_v17 = vadd.f32 %v4516_v27, %v1774_v8  ;;  %v3294_v9 = vpop.f32.mrb[149].mxu0 }
 0x348   : > { %1921 = vst.msk [vmem:[%s4524_s26 + $0x150] sm:$0xff] %vm1878_vm2, %v1775_v17 }
 0x349   : > { %v1779_v63 = vpop.f32.mrb[150].mxu0 }
 0x34a   : > { %v1780_v23 = vadd.f32 %v4516_v27, %v1779_v63  ;;  %v3297_v13 = vpop.f32.mrb[151].mxu0 }
 0x34c   : > { %1922 = vst.msk [vmem:[%s4524_s26 + $0x158] sm:$0xff] %vm1878_vm2, %v1780_v23 }
 0x34d   : > { %v1784_v32 = vpop.f32.mrb[152].mxu0 }
 0x34e   : > { %v1785_v15 = vadd.f32 %v4516_v27, %v1784_v32  ;;  %v3300_v38 = vpop.f32.mrb[153].mxu0 }
 0x350   : > { %1923 = vst.msk [vmem:[%s4524_s26 + $0x160] sm:$0xff] %vm1878_vm2, %v1785_v15 }
 0x351   : > { %v1789_v10 = vpop.f32.mrb[154].mxu0 }
 0x352   : > { %v1790_v16 = vadd.f32 %v4516_v27, %v1789_v10  ;;  %v3303_v45 = vpop.f32.mrb[155].mxu0 }
 0x354   : > { %1924 = vst.msk [vmem:[%s4524_s26 + $0x168] sm:$0xff] %vm1878_vm2, %v1790_v16 }
 0x355   : > { %v1794_v18 = vpop.f32.mrb[156].mxu0 }
 0x356   : > { %v1795_v51 = vadd.f32 %v4516_v27, %v1794_v18  ;;  %v3306_v19 = vpop.f32.mrb[157].mxu0 }
 0x358   : > { %1925 = vst.msk [vmem:[%s4524_s26 + $0x170] sm:$0xff] %vm1878_vm2, %v1795_v51 }
 0x359   : > { %v1799_v22 = vpop.f32.mrb[158].mxu0 }
 0x35a   : > { %v1800_v62 = vadd.f32 %v4516_v27, %v1799_v22  ;;  %v3309_v24 = vpop.f32.mrb[159].mxu0 }
 0x35c   : > { %1926 = vst.msk [vmem:[%s4524_s26 + $0x178] sm:$0xff] %vm1878_vm2, %v1800_v62 }
 0x35d   : > { %v1804_v6 = vpop.f32.mrb[160].mxu0 }
 0x35e   : > { %v1805_v25 = vadd.f32 %v4516_v27, %v1804_v6  ;;  %v3312_v14 = vpop.f32.mrb[161].mxu0 }
 0x360   : > { %1927 = vst.msk [vmem:[%s4524_s26 + $0x180] sm:$0xff] %vm1878_vm2, %v1805_v25 }
 0x361   : > { %v1809_v30 = vpop.f32.mrb[162].mxu0 }
 0x362   : > { %v1810_v26 = vadd.f32 %v4516_v27, %v1809_v30  ;;  %v3315_v21 = vpop.f32.mrb[163].mxu0 }
 0x364   : > { %1928 = vst.msk [vmem:[%s4524_s26 + $0x188] sm:$0xff] %vm1878_vm2, %v1810_v26 }
 0x365   : > { %v1814_v31 = vpop.f32.mrb[164].mxu0 }
 0x366   : > { %v1815_v29 = vadd.f32 %v4516_v27, %v1814_v31  ;;  %v3318_v42 = vpop.f32.mrb[165].mxu0 }
 0x368   : > { %1929 = vst.msk [vmem:[%s4524_s26 + $0x190] sm:$0xff] %vm1878_vm2, %v1815_v29 }
 0x369   : > { %v1819_v39 = vpop.f32.mrb[166].mxu0 }
 0x36a   : > { %v1820_v33 = vadd.f32 %v4516_v27, %v1819_v39  ;;  %v3321_v47 = vpop.f32.mrb[167].mxu0 }
 0x36c   : > { %1930 = vst.msk [vmem:[%s4524_s26 + $0x198] sm:$0xff] %vm1878_vm2, %v1820_v33 }
 0x36d   : > { %v1824_v12 = vpop.f32.mrb[168].mxu0 }
 0x36e   : > { %v1825_v34 = vadd.f32 %v4516_v27, %v1824_v12  ;;  %v3324_v54 = vpop.f32.mrb[169].mxu0 }
 0x370   : > { %1931 = vst.msk [vmem:[%s4524_s26 + $0x1a0] sm:$0xff] %vm1878_vm2, %v1825_v34 }
 0x371   : > { %v1829_v7 = vpop.f32.mrb[170].mxu0 }
 0x372   : > { %v1830_v35 = vadd.f32 %v4516_v27, %v1829_v7  ;;  %v3327_v40 = vpop.f32.mrb[171].mxu0 }
 0x374   : > { %1932 = vst.msk [vmem:[%s4524_s26 + $0x1a8] sm:$0xff] %vm1878_vm2, %v1830_v35 }
 0x375   : > { %v1834_v53 = vpop.f32.mrb[172].mxu0 }
 0x376   : > { %v1835_v1 = vadd.f32 %v4516_v27, %v1834_v53  ;;  %v3330_v37 = vpop.f32.mrb[173].mxu0 }
 0x378   : > { %1933 = vst.msk [vmem:[%s4524_s26 + $0x1b0] sm:$0xff] %vm1878_vm2, %v1835_v1 }
 0x379   : > { %v1839_v41 = vpop.f32.mrb[174].mxu0 }
 0x37a   : > { %v1840_v20 = vadd.f32 %v4516_v27, %v1839_v41  ;;  %v3333_v43 = vpop.f32.mrb[175].mxu0 }
 0x37c   : > { %1934 = vst.msk [vmem:[%s4524_s26 + $0x1b8] sm:$0xff] %vm1878_vm2, %v1840_v20 }
 0x37d   : > { %v1844_v44 = vpop.f32.mrb[176].mxu0 }
 0x37e   : > { %v1845_v48 = vadd.f32 %v4516_v27, %v1844_v44  ;;  %v3336_v28 = vpop.f32.mrb[177].mxu0 }
 0x380   : > { %1935 = vst.msk [vmem:[%s4524_s26 + $0x1c0] sm:$0xff] %vm1878_vm2, %v1845_v48 }
 0x381   : > { %v1849_v4 = vpop.f32.mrb[178].mxu0 }
 0x382   : > { %v1850_v49 = vadd.f32 %v4516_v27, %v1849_v4  ;;  %v3339_v50 = vpop.f32.mrb[179].mxu0 }
 0x384   : > { %1936 = vst.msk [vmem:[%s4524_s26 + $0x1c8] sm:$0xff] %vm1878_vm2, %v1850_v49 }
 0x385   : > { %v1854_v56 = vpop.f32.mrb[180].mxu0 }
 0x386   : > { %v1855_v57 = vadd.f32 %v4516_v27, %v1854_v56  ;;  %v3342_v36 = vpop.f32.mrb[181].mxu0 }
 0x388   : > { %1937 = vst.msk [vmem:[%s4524_s26 + $0x1d0] sm:$0xff] %vm1878_vm2, %v1855_v57 }
 0x389   : > { %v1859_v59 = vpop.f32.mrb[182].mxu0 }
 0x38a   : > { %v1860_v60 = vadd.f32 %v4516_v27, %v1859_v59  ;;  %v3345_v52 = vpop.f32.mrb[183].mxu0 }
 0x38c   : > { %1938 = vst.msk [vmem:[%s4524_s26 + $0x1d8] sm:$0xff] %vm1878_vm2, %v1860_v60 }
 0x38d   : > { %v1864_v46 = vpop.f32.mrb[184].mxu0 }
 0x38e   : > { %v1865_v61 = vadd.f32 %v4516_v27, %v1864_v46  ;;  %v3348_v0 = vpop.f32.mrb[185].mxu0 }
 0x390   : > { %1939 = vst.msk [vmem:[%s4524_s26 + $0x1e0] sm:$0xff] %vm1878_vm2, %v1865_v61 }
 0x391   : > { %v1869_v58 = vpop.f32.mrb[186].mxu0 }
 0x392   : > { %v1870_v2 = vadd.f32 %v4516_v27, %v1869_v58  ;;  %v3351_v3 = vpop.f32.mrb[187].mxu0  ;;  %1948 = sbr.rel (!%p3669_p4) target bundleno = 1005 (0x3ed), region = 52 }
 0x394   : > { %1940 = vst.msk [vmem:[%s4524_s26 + $0x1e8] sm:$0xff] %vm1878_vm2, %v1870_v2 }
 0x395   : > { %v1874_v55 = vpop.f32.mrb[188].mxu0 }
 0x396   : > { %v1875_v5 = vadd.f32 %v4516_v27, %v1874_v55  ;;  %v3354_v11 = vpop.f32.mrb[189].mxu0 }
 0x398   : > { %1941 = vst.msk [vmem:[%s4524_s26 + $0x1f0] sm:$0xff] %vm1878_vm2, %v1875_v5 }
 0x399   : > { %s4955_s24 = smov (!%p1951_p8, %s1950_s24), 63 }
 0x39a   : > { %s2478_s15 = sshll.u32 %s4955_s24, 7 }
 0x39b   : > { %p2481_p9 = scmp.eq.s32.totalorder %s2478_s15, 0 }
 0x39c   : > { %3506 = sdivrem.u32 (!%p2481_p9), %s4955_s24, 63 }
 0x39d   : > { %1959 = sbr.rel (%p2481_p9) target bundleno = 1005 (0x3ed), region = 56 }
 0x3a5   : > { %s4751_s10 = spop.drf %3506 }
 0x3a6   : > { %p2482_p10 = scmp.le.s32.totalorder %s4751_s10, 0 }
 0x3a7   : > { %s4946_s6 = smov (!%p2482_p10), %s4745_s14  ;;  %s4947_s19 = smov (!%p2482_p10), %s4524_s26 }
 0x3a8   : > { %2363 = sbr.rel (%p2482_p10) target bundleno = 976 (0x3d0), region = 132  ;;  %s4760_s16 = smov (!%p2482_p10), 0  }
 0x3a9   : > { %s4762_s17 = smov (!%p2482_p10), 0  }
 0x3af LB: >> { %v2147_v27 = vld [vmem:[%s3572_s19] sm:$0xff]  ;;  %v2149_v8 = vld [vmem:[%s3572_s19 + $0x8] sm:$0xff]  ;;  %v2151_v17 = vld [vmem:[%s3572_s19 + $0x10] sm:$0xff]  ;;  %s2273_s18 = sadd.s32 1, %s3576_s16  ;;  %s2141_s17 = sadd.s32 1, %s3580_s17   ;;  %s3580_s17 = sphi %s4762_s17, %s2141_s17   ;;  %s3576_s16 = sphi %s4760_s16, %s4950_s16   ;;  %s3572_s19 = sphi %s4947_s19, %s4949_s19   ;;  %s3568_s6 = sphi %s4946_s6, %s4948_s6  }
 0x3b0   : >> { %2148 = vst [vmem:[%s3568_s6] sm:$0xff] %v2147_v27  ;;  %2150 = vst [vmem:[%s3568_s6 + $0x8] sm:$0xff] %v2149_v8  ;;  %v2153_v9 = vld [vmem:[%s3572_s19 + $0x18] sm:$0xff]  ;;  %v2155_v63 = vld [vmem:[%s3572_s19 + $0x20] sm:$0xff]  ;;  %p2274_p11 = scmp.ge.s32.totalorder %s2273_s18, %s4751_s10  ;;  %p2140_p12 = scmp.ge.s32.totalorder %s2141_s17, %s4751_s10 }
 0x3b1   : >> { %2152 = vst [vmem:[%s3568_s6 + $0x10] sm:$0xff] %v2151_v17  ;;  %v2157_v23 = vld [vmem:[%s3572_s19 + $0x28] sm:$0xff]  ;;  %2154 = vst [vmem:[%s3568_s6 + $0x18] sm:$0xff] %v2153_v9  ;;  %v2159_v13 = vld [vmem:[%s3572_s19 + $0x30] sm:$0xff] }
 0x3b2   : >> { %2156 = vst [vmem:[%s3568_s6 + $0x20] sm:$0xff] %v2155_v63  ;;  %2158 = vst [vmem:[%s3568_s6 + $0x28] sm:$0xff] %v2157_v23  ;;  %v2161_v32 = vld [vmem:[%s3572_s19 + $0x38] sm:$0xff]  ;;  %v2163_v15 = vld [vmem:[%s3572_s19 + $0x40] sm:$0xff]  ;;  %s4957_s18 = smov (%p2274_p11, %s2273_s18), 0 }
 0x3b3   : >> { %2160 = vst [vmem:[%s3568_s6 + $0x30] sm:$0xff] %v2159_v13  ;;  %2162 = vst [vmem:[%s3568_s6 + $0x38] sm:$0xff] %v2161_v32  ;;  %v2165_v38 = vld [vmem:[%s3572_s19 + $0x48] sm:$0xff]  ;;  %v2167_v10 = vld [vmem:[%s3572_s19 + $0x50] sm:$0xff]  ;;  %s2276_s20 = smul.u32 504, %s4957_s18  ;;  %s4950_s16 = smov %s4957_s18 }
 0x3b4   : >> { %2164 = vst [vmem:[%s3568_s6 + $0x40] sm:$0xff] %v2163_v15  ;;  %v2169_v16 = vld [vmem:[%s3572_s19 + $0x58] sm:$0xff]  ;;  %2166 = vst [vmem:[%s3568_s6 + $0x48] sm:$0xff] %v2165_v38  ;;  %v2171_v45 = vld [vmem:[%s3572_s19 + $0x60] sm:$0xff] }
 0x3b5   : >> { %2168 = vst [vmem:[%s3568_s6 + $0x50] sm:$0xff] %v2167_v10  ;;  %2170 = vst [vmem:[%s3568_s6 + $0x58] sm:$0xff] %v2169_v16  ;;  %v2173_v18 = vld [vmem:[%s3572_s19 + $0x68] sm:$0xff]  ;;  %v2175_v51 = vld [vmem:[%s3572_s19 + $0x70] sm:$0xff]  ;;  %s4824_s21 = scalar_lea.vmem %s4524_s26, %s2276_s20 [#allocation3]   ;;  %s4827_s22 = scalar_lea.vmem %s4745_s14, %s2276_s20  }
 0x3b6   : >> { %2172 = vst [vmem:[%s3568_s6 + $0x60] sm:$0xff] %v2171_v45  ;;  %2174 = vst [vmem:[%s3568_s6 + $0x68] sm:$0xff] %v2173_v18  ;;  %v2177_v19 = vld [vmem:[%s3572_s19 + $0x78] sm:$0xff]  ;;  %v2179_v22 = vld [vmem:[%s3572_s19 + $0x80] sm:$0xff] }
 0x3b7   : >> { %2176 = vst [vmem:[%s3568_s6 + $0x70] sm:$0xff] %v2175_v51  ;;  %v2181_v62 = vld [vmem:[%s3572_s19 + $0x88] sm:$0xff]  ;;  %2178 = vst [vmem:[%s3568_s6 + $0x78] sm:$0xff] %v2177_v19  ;;  %v2183_v24 = vld [vmem:[%s3572_s19 + $0x90] sm:$0xff] }
 0x3b8   : >> { %2180 = vst [vmem:[%s3568_s6 + $0x80] sm:$0xff] %v2179_v22  ;;  %2182 = vst [vmem:[%s3568_s6 + $0x88] sm:$0xff] %v2181_v62  ;;  %v2185_v6 = vld [vmem:[%s3572_s19 + $0x98] sm:$0xff]  ;;  %v2187_v25 = vld [vmem:[%s3572_s19 + $0xa0] sm:$0xff] }
 0x3b9   : >> { %2184 = vst [vmem:[%s3568_s6 + $0x90] sm:$0xff] %v2183_v24  ;;  %2186 = vst [vmem:[%s3568_s6 + $0x98] sm:$0xff] %v2185_v6  ;;  %v2189_v14 = vld [vmem:[%s3572_s19 + $0xa8] sm:$0xff]  ;;  %v2191_v30 = vld [vmem:[%s3572_s19 + $0xb0] sm:$0xff] }
 0x3ba   : >> { %2188 = vst [vmem:[%s3568_s6 + $0xa0] sm:$0xff] %v2187_v25  ;;  %v2193_v26 = vld [vmem:[%s3572_s19 + $0xb8] sm:$0xff]  ;;  %2190 = vst [vmem:[%s3568_s6 + $0xa8] sm:$0xff] %v2189_v14  ;;  %v2195_v21 = vld [vmem:[%s3572_s19 + $0xc0] sm:$0xff] }
 0x3bb   : >> { %2192 = vst [vmem:[%s3568_s6 + $0xb0] sm:$0xff] %v2191_v30  ;;  %2194 = vst [vmem:[%s3568_s6 + $0xb8] sm:$0xff] %v2193_v26  ;;  %v2197_v31 = vld [vmem:[%s3572_s19 + $0xc8] sm:$0xff]  ;;  %v2199_v29 = vld [vmem:[%s3572_s19 + $0xd0] sm:$0xff] }
 0x3bc   : >> { %2196 = vst [vmem:[%s3568_s6 + $0xc0] sm:$0xff] %v2195_v21  ;;  %2198 = vst [vmem:[%s3568_s6 + $0xc8] sm:$0xff] %v2197_v31  ;;  %v2201_v42 = vld [vmem:[%s3572_s19 + $0xd8] sm:$0xff]  ;;  %v2203_v39 = vld [vmem:[%s3572_s19 + $0xe0] sm:$0xff] }
 0x3bd   : >> { %2200 = vst [vmem:[%s3568_s6 + $0xd0] sm:$0xff] %v2199_v29  ;;  %v2205_v33 = vld [vmem:[%s3572_s19 + $0xe8] sm:$0xff]  ;;  %2202 = vst [vmem:[%s3568_s6 + $0xd8] sm:$0xff] %v2201_v42  ;;  %v2207_v47 = vld [vmem:[%s3572_s19 + $0xf0] sm:$0xff] }
 0x3be   : >> { %2204 = vst [vmem:[%s3568_s6 + $0xe0] sm:$0xff] %v2203_v39  ;;  %2206 = vst [vmem:[%s3568_s6 + $0xe8] sm:$0xff] %v2205_v33  ;;  %v2209_v12 = vld [vmem:[%s3572_s19 + $0xf8] sm:$0xff]  ;;  %v2211_v34 = vld [vmem:[%s3572_s19 + $0x100] sm:$0xff] }
 0x3bf   : >> { %2208 = vst [vmem:[%s3568_s6 + $0xf0] sm:$0xff] %v2207_v47  ;;  %2210 = vst [vmem:[%s3568_s6 + $0xf8] sm:$0xff] %v2209_v12  ;;  %v2213_v54 = vld [vmem:[%s3572_s19 + $0x108] sm:$0xff]  ;;  %v2215_v7 = vld [vmem:[%s3572_s19 + $0x110] sm:$0xff] }
 0x3c0   : >> { %2212 = vst [vmem:[%s3568_s6 + $0x100] sm:$0xff] %v2211_v34  ;;  %v2217_v35 = vld [vmem:[%s3572_s19 + $0x118] sm:$0xff]  ;;  %2214 = vst [vmem:[%s3568_s6 + $0x108] sm:$0xff] %v2213_v54  ;;  %v2219_v40 = vld [vmem:[%s3572_s19 + $0x120] sm:$0xff] }
 0x3c1   : >> { %2216 = vst [vmem:[%s3568_s6 + $0x110] sm:$0xff] %v2215_v7  ;;  %2218 = vst [vmem:[%s3568_s6 + $0x118] sm:$0xff] %v2217_v35  ;;  %v2221_v53 = vld [vmem:[%s3572_s19 + $0x128] sm:$0xff]  ;;  %v2223_v1 = vld [vmem:[%s3572_s19 + $0x130] sm:$0xff] }
 0x3c2   : >> { %2220 = vst [vmem:[%s3568_s6 + $0x120] sm:$0xff] %v2219_v40  ;;  %2222 = vst [vmem:[%s3568_s6 + $0x128] sm:$0xff] %v2221_v53  ;;  %v2225_v37 = vld [vmem:[%s3572_s19 + $0x138] sm:$0xff]  ;;  %v2227_v41 = vld [vmem:[%s3572_s19 + $0x140] sm:$0xff] }
 0x3c3   : >> { %2224 = vst [vmem:[%s3568_s6 + $0x130] sm:$0xff] %v2223_v1  ;;  %v2229_v20 = vld [vmem:[%s3572_s19 + $0x148] sm:$0xff]  ;;  %2226 = vst [vmem:[%s3568_s6 + $0x138] sm:$0xff] %v2225_v37  ;;  %v2231_v43 = vld [vmem:[%s3572_s19 + $0x150] sm:$0xff] }
 0x3c4   : >> { %2228 = vst [vmem:[%s3568_s6 + $0x140] sm:$0xff] %v2227_v41  ;;  %2230 = vst [vmem:[%s3568_s6 + $0x148] sm:$0xff] %v2229_v20  ;;  %v2233_v44 = vld [vmem:[%s3572_s19 + $0x158] sm:$0xff]  ;;  %v2235_v48 = vld [vmem:[%s3572_s19 + $0x160] sm:$0xff] }
 0x3c5   : >> { %2232 = vst [vmem:[%s3568_s6 + $0x150] sm:$0xff] %v2231_v43  ;;  %2234 = vst [vmem:[%s3568_s6 + $0x158] sm:$0xff] %v2233_v44  ;;  %v2237_v28 = vld [vmem:[%s3572_s19 + $0x168] sm:$0xff]  ;;  %v2239_v4 = vld [vmem:[%s3572_s19 + $0x170] sm:$0xff] }
 0x3c6   : >> { %2236 = vst [vmem:[%s3568_s6 + $0x160] sm:$0xff] %v2235_v48  ;;  %v2241_v49 = vld [vmem:[%s3572_s19 + $0x178] sm:$0xff]  ;;  %2238 = vst [vmem:[%s3568_s6 + $0x168] sm:$0xff] %v2237_v28  ;;  %v2243_v50 = vld [vmem:[%s3572_s19 + $0x180] sm:$0xff] }
 0x3c7   : >> { %2240 = vst [vmem:[%s3568_s6 + $0x170] sm:$0xff] %v2239_v4  ;;  %2242 = vst [vmem:[%s3568_s6 + $0x178] sm:$0xff] %v2241_v49  ;;  %v2245_v56 = vld [vmem:[%s3572_s19 + $0x188] sm:$0xff]  ;;  %v2247_v57 = vld [vmem:[%s3572_s19 + $0x190] sm:$0xff] }
 0x3c8   : >> { %2244 = vst [vmem:[%s3568_s6 + $0x180] sm:$0xff] %v2243_v50  ;;  %2246 = vst [vmem:[%s3568_s6 + $0x188] sm:$0xff] %v2245_v56  ;;  %v2249_v36 = vld [vmem:[%s3572_s19 + $0x198] sm:$0xff]  ;;  %v2251_v59 = vld [vmem:[%s3572_s19 + $0x1a0] sm:$0xff] }
 0x3c9   : >> { %2248 = vst [vmem:[%s3568_s6 + $0x190] sm:$0xff] %v2247_v57  ;;  %v2253_v60 = vld [vmem:[%s3572_s19 + $0x1a8] sm:$0xff]  ;;  %2250 = vst [vmem:[%s3568_s6 + $0x198] sm:$0xff] %v2249_v36  ;;  %v2255_v52 = vld [vmem:[%s3572_s19 + $0x1b0] sm:$0xff]  ;;  %2143 = sbr.rel (!%p2140_p12) target bundleno = 943 (0x3af), region = 138 }
 0x3ca   : >> { %2252 = vst [vmem:[%s3568_s6 + $0x1a0] sm:$0xff] %v2251_v59  ;;  %2254 = vst [vmem:[%s3568_s6 + $0x1a8] sm:$0xff] %v2253_v60  ;;  %v2257_v46 = vld [vmem:[%s3572_s19 + $0x1b8] sm:$0xff]  ;;  %v2259_v61 = vld [vmem:[%s3572_s19 + $0x1c0] sm:$0xff] }
 0x3cb   : >> { %2256 = vst [vmem:[%s3568_s6 + $0x1b0] sm:$0xff] %v2255_v52  ;;  %2258 = vst [vmem:[%s3568_s6 + $0x1b8] sm:$0xff] %v2257_v46  ;;  %v2261_v0 = vld [vmem:[%s3572_s19 + $0x1c8] sm:$0xff]  ;;  %v2263_v58 = vld [vmem:[%s3572_s19 + $0x1d0] sm:$0xff] }
 0x3cc   : >> { %2260 = vst [vmem:[%s3568_s6 + $0x1c0] sm:$0xff] %v2259_v61  ;;  %v2265_v2 = vld [vmem:[%s3572_s19 + $0x1d8] sm:$0xff]  ;;  %2262 = vst [vmem:[%s3568_s6 + $0x1c8] sm:$0xff] %v2261_v0  ;;  %v2267_v3 = vld [vmem:[%s3572_s19 + $0x1e0] sm:$0xff] }
 0x3cd   : >> { %2264 = vst [vmem:[%s3568_s6 + $0x1d0] sm:$0xff] %v2263_v58  ;;  %2266 = vst [vmem:[%s3568_s6 + $0x1d8] sm:$0xff] %v2265_v2  ;;  %v2269_v55 = vld [vmem:[%s3572_s19 + $0x1e8] sm:$0xff]  ;;  %v2271_v5 = vld [vmem:[%s3572_s19 + $0x1f0] sm:$0xff]  ;;  %s4949_s19 = smov %s4824_s21 }
 0x3ce   : >> { %2268 = vst [vmem:[%s3568_s6 + $0x1e0] sm:$0xff] %v2267_v3  ;;  %2270 = vst [vmem:[%s3568_s6 + $0x1e8] sm:$0xff] %v2269_v55 }
 0x3cf   : >> { %2272 = vst [vmem:[%s3568_s6 + $0x1f0] sm:$0xff] %v2271_v5  ;;  %s4948_s6 = smov %s4827_s22 }
 0x3d0 PF: > { %3508 = sdivrem.u32 %s4955_s24, 63 }
 0x3d1   : > { %s2483_s23 = smul.u32 504, %s4751_s10 }
 0x3d3   : > { %s2284_s25 = scalar_lea.vmem %s4524_s26, %s2483_s23 [#allocation3]   ;;  %s2286_s28 = scalar_lea.vmem %s4745_s14, %s2483_s23  }
 0x3d9   : > { %s3509_s30 = spop.drf %3508 }
 0x3da   : > { %p2485_p13 = scmp.le.s32.totalorder %s3509_s30, 0 }
 0x3db   : > { %s3582_s8 = smov (!%p2485_p13), %s2286_s28   ;;  %s3586_s11 = smov (!%p2485_p13), %s2284_s25  }
 0x3dc   : > { %2377 = sbr.rel (%p2485_p13) target bundleno = 1005 (0x3ed), region = 143  ;;  %s3590_s12 = smov (!%p2485_p13), 0  }
 0x3dd   : > { %s3594_s13 = smov (!%p2485_p13), 0  }
 0x3e3 LB: >> { %v2296_v11 = vld [vmem:[%s3588_s11] sm:$0xff]  ;;  %s2298_s15 = sadd.s32 1, %s3592_s12  ;;  %s2290_s13 = sadd.s32 1, %s3596_s13   ;;  %s3596_s13 = sphi %s3594_s13, %s2290_s13   ;;  %s3592_s12 = sphi %s3590_s12, %s3591_s12   ;;  %s3588_s11 = sphi %s3586_s11, %s2303_s11   ;;  %s3584_s8 = sphi %s3582_s8, %s2304_s8  }
 0x3e4   : >> { %2297 = vst [vmem:[%s3584_s8] sm:$0xff] %v2296_v11  ;;  %p2299_p0 = scmp.ge.s32.totalorder %s2298_s15, %s3509_s30  ;;  %p2289_p1 = scmp.ge.s32.totalorder %s2290_s13, %s3509_s30 }
 0x3e6   : >> { %s4959_s15 = smov (%p2299_p0, %s2298_s15), 0  ;;  %2292 = sbr.rel (!%p2289_p1) target bundleno = 995 (0x3e3), region = 149 }
 0x3e7   : >> { %s2486_s26 = sshll.u32 %s4959_s15, 3  ;;  %s3591_s12 = smov %s4959_s15  }
 0x3e8   : >> { %s2303_s11 = scalar_lea.vmem %s2284_s25, %s2486_s26 [#allocation3]   ;;  %s2304_s8 = scalar_lea.vmem %s2286_s28, %s2486_s26  }
 0x3ed PF: > { %p16_p2 = scmp.ge.s32.totalorder %s3659_s29, 4   ;;  %s4951_s26 = smov %s3560_s27 }
 0x3ee   : > { %s4952_s27 = smov %s3667_s9  ;;  %s4953_s28 = smov %s3659_s29 }
 0x3ef   :  { %18 = sbr.rel (!%p16_p2) target bundleno = 5 (0x5), region = 160 }

</bundles_post_ra>
